<compile_context>
chip_gen: v5e
topology: v5e:2x2
jax: 0.10.0
libtpu: 0.0.40
codegen_flags: <defaults>
</compile_context>

<pallas_src>
import functools

import numpy as np

import jax
import jax.numpy as jnp
from jax.experimental import pallas as pl
from jax.experimental.pallas import tpu as pltpu

_EPS = 1e-5
_HI = jax.lax.Precision.HIGHEST  # reference only


def _border_masks(N, H, W):
    """Static (9, N*H*W) f32 masks for the 3x3 taps, built with numpy.

    Row t (dh, dw in row-major -1..1 order) is 1.0 where the shifted pixel
    (h+dh, w+dw) is inside the image; this also kills batch-boundary wrap of
    the flat-axis rolls.
    """
    NHW = N * H * W
    idx = np.arange(NHW)
    w_idx = idx % W
    h_idx = (idx // W) % H
    rows = []
    for dh in (-1, 0, 1):
        for dw in (-1, 0, 1):
            ok = ((h_idx + dh >= 0) & (h_idx + dh < H) &
                  (w_idx + dw >= 0) & (w_idx + dw < W))
            rows.append(ok)
    return jnp.asarray(np.stack(rows).astype(np.float32))


def resblock3_kernel(W,
                     xt_ref, w1s_ref, w2_ref, w3_ref, gb_ref, mask_ref,
                     o_ref, patches_ref):
    NHW = xt_ref.shape[1]
    C2, nine_c1 = w2_ref.shape
    C1 = nine_c1 // 9
    C3 = w3_ref.shape[0]
    inv_n = 1.0 / NHW

    # Ones column used by the MXU-based BN stat reductions.
    ones_col = jnp.ones((NHW, 1), jnp.float32)

    def bn_stats(h):
        """sum / sum-of-squares along lanes via one MXU dot (XLU stays free)."""
        stacked = jnp.concatenate([h, h * h], axis=0)          # (2C, NHW)
        return jnp.dot(stacked, ones_col,
                       preferred_element_type=jnp.float32)     # (2C, 1)

    def bn_affine(s, gamma, beta):
        """Training-mode BN folded affine from stacked [sum; sumsq] stats.

        NOTE: var = E[x^2] - E[x]^2 can cancel for large-mean activations;
        fine at this scale, prefer a shifted/two-pass form for real nets.
        """
        C = gamma.shape[0]
        mean = s[:C] * inv_n
        msq = s[C:] * inv_n
        var = msq - mean * mean
        a = gamma * jax.lax.rsqrt(var + _EPS)
        b = beta - mean * a
        return a, b

    x = xt_ref[...]                                            # (C0, NHW) f32

    # ---- stage 1 + projection shortcut: one merged matmul (shared RHS x) ---
    hs = jnp.dot(w1s_ref[...], x, preferred_element_type=jnp.float32)
    h1p = hs[:C1]                                              # (C1, NHW)
    scp = hs[C1:]                                              # (C3, NHW)

    g1, be1 = gb_ref[0:C1, 0:1], gb_ref[0:C1, 1:2]
    a1, b1 = bn_affine(bn_stats(h1p), g1, be1)
    h1 = jnp.maximum(h1p * a1 + b1, 0.0)

    # ---- stage 2: 3x3 conv (pad=1, stride=1) as ONE im2col matmul ----------
    # Taps are XLU lane rolls of the flat (n,h,w) axis; static border masks
    # (trace-time numpy input) zero out-of-image / cross-batch positions.
    # Each masked tap is streamed into the VMEM patches scratch.
    t = 0
    for dh in (-1, 0, 1):
        for dw in (-1, 0, 1):
            off = dh * W + dw
            if off == 0:
                tap = h1                                       # center: no mask
            else:
                tap = pltpu.roll(h1, (-off) % NHW, 1) * mask_ref[t:t + 1, :]
            patches_ref[t * C1:(t + 1) * C1, :] = tap
            t += 1

    h2p = jnp.dot(w2_ref[...], patches_ref[...],
                  preferred_element_type=jnp.float32)          # (C2, NHW)
    g2, be2 = gb_ref[C1:C1 + C2, 0:1], gb_ref[C1:C1 + C2, 1:2]
    a2, b2 = bn_affine(bn_stats(h2p), g2, be2)
    h2 = jnp.maximum(h2p * a2 + b2, 0.0)

    # ---- stage 3 (1x1 conv -> BN) + shortcut BN + residual add + ReLU ------
    h3p = jnp.dot(w3_ref[...], h2, preferred_element_type=jnp.float32)  # (C3, NHW)

    o3 = C1 + C2
    g3, be3 = gb_ref[o3:o3 + C3, 0:1], gb_ref[o3:o3 + C3, 1:2]
    gs, bes = gb_ref[o3 + C3:o3 + 2 * C3, 0:1], gb_ref[o3 + C3:o3 + 2 * C3, 1:2]

    # One stacked stats dot covers BOTH the stage-3 and shortcut BNs.
    s34 = jnp.dot(jnp.concatenate([h3p, h3p * h3p, scp, scp * scp], axis=0),
                  ones_col, preferred_element_type=jnp.float32)  # (4*C3, 1)
    a3, b3 = bn_affine(s34[:2 * C3], g3, be3)
    a4, b4 = bn_affine(s34[2 * C3:], gs, bes)

    # Lane-dense (C3, NHW) store (unmasked vst).
    o_ref[...] = jnp.maximum(h3p * a3 + b3 + scp * a4 + b4, 0.0).astype(o_ref.dtype)


@jax.jit
def resblock3_forward(x_nchw, params):
    """ResBlock3 forward pass. Input/output layout: NCHW (PyTorch)."""
    N, C0, H, W = x_nchw.shape
    NHW = N * H * W
    assert NHW % 128 == 0, "kernel assumes a lane-dense N*H*W multiple of 128"
    C1 = params["w1"].shape[1]
    C2 = params["w2"].shape[3]
    C3 = params["w3"].shape[1]

    # --- layout glue (XLA): NCHW -> lane-dense (C, N*H*W); packed weights. ---
    xt = jnp.transpose(x_nchw, (1, 0, 2, 3)).reshape(C0, NHW)
    w1s = jnp.concatenate([params["w1"].T, params["ws"].T], axis=0)  # (C1+C3, C0)
    w2r = params["w2"].reshape(9 * C1, C2).T                         # (C2, 9*C1)
    w3t = params["w3"].T                                             # (C3, C2)

    col = lambda g, b: jnp.stack([g.reshape(-1), b.reshape(-1)], axis=1)  # (C, 2)
    gb = jnp.concatenate([col(params["g1"], params["be1"]),
                          col(params["g2"], params["be2"]),
                          col(params["g3"], params["be3"]),
                          col(params["gs"], params["bes"])], axis=0)  # (C1+C2+2*C3, 2)

    mask = _border_masks(N, H, W)                                     # (9, NHW)

    # NOTE: conv biases b1/b2/b3 are intentionally not passed to the kernel —
    # they are mathematically removed by training-mode BN's mean subtraction.
    args = (xt, w1s, w2r, w3t, gb, mask)

    vmem = pl.BlockSpec(memory_space=pltpu.MemorySpace.VMEM)
    out_t = pl.pallas_call(
        functools.partial(resblock3_kernel, W),
        out_shape=jax.ShapeDtypeStruct((C3, NHW), x_nchw.dtype),
        in_specs=[vmem] * len(args),
        out_specs=vmem,
        scratch_shapes=[pltpu.VMEM((9 * C1, NHW), jnp.float32)],
    )(*args)

    # (C3, N*H*W) -> NCHW
    return jnp.transpose(out_t.reshape(C3, N, H, W), (1, 0, 2, 3))


# ---------------------------------------------------------------------------
# Pure-JAX reference (lax.conv, f32 HIGHEST, biases included) for verification.
# ---------------------------------------------------------------------------
def _ref_forward(x_nchw, p):
    x = jnp.transpose(x_nchw, (0, 2, 3, 1))

    def conv(h, w, b, pad):
        if w.ndim == 2:
            w = w.reshape(1, 1, *w.shape)
        y = jax.lax.conv_general_dilated(
            h, w, window_strides=(1, 1), padding=[(pad, pad), (pad, pad)],
            dimension_numbers=("NHWC", "HWIO", "NHWC"), precision=_HI)
        return y if b is None else y + b

    def bn(h, g, be):
        m = jnp.mean(h, axis=(0, 1, 2), keepdims=True)
        v = jnp.mean((h - m) ** 2, axis=(0, 1, 2), keepdims=True)
        return (h - m) * jax.lax.rsqrt(v + _EPS) * g + be

    h = jax.nn.relu(bn(conv(x, p["w1"], p["b1"], 0), p["g1"], p["be1"]))
    h = jax.nn.relu(bn(conv(h, p["w2"], p["b2"], 1), p["g2"], p["be2"]))
    h = bn(conv(h, p["w3"], p["b3"], 0), p["g3"], p["be3"])
    s = bn(conv(x, p["ws"], None, 0), p["gs"], p["bes"])
    return jnp.transpose(jax.nn.relu(h + s), (0, 3, 1, 2))


if __name__ == "__main__":
    # ResBlock3(in_channels=[4, 8, 8], out_channels=[8, 8, 16],
    #           strides=[1, 1, 1], kernel_size=[1, 3, 1])
    N, H, W = 2, 16, 16
    C0, C1, C2, C3 = 4, 8, 8, 16

    key = jax.random.PRNGKey(0)
    keys = jax.random.split(key, 16)

    def nrm(k, shape, scale=0.1):
        return scale * jax.random.normal(k, shape, dtype=jnp.float32)

    params = {
        # conv weights: 1x1 convs stored as (Cin, Cout); 3x3 conv as HWIO.
        "w1": nrm(keys[0], (C0, C1)),
        "b1": nrm(keys[1], (1, C1)),
        "g1": 1.0 + nrm(keys[2], (1, C1)),
        "be1": nrm(keys[3], (1, C1)),
        "w2": nrm(keys[4], (3, 3, C1, C2)),
        "b2": nrm(keys[5], (1, C2)),
        "g2": 1.0 + nrm(keys[6], (1, C2)),
        "be2": nrm(keys[7], (1, C2)),
        "w3": nrm(keys[8], (C2, C3)),
        "b3": nrm(keys[9], (1, C3)),
        "g3": 1.0 + nrm(keys[10], (1, C3)),
        "be3": nrm(keys[11], (1, C3)),
        "ws": nrm(keys[12], (C0, C3)),   # shortcut conv (bias=False)
        "gs": 1.0 + nrm(keys[13], (1, C3)),
        "bes": nrm(keys[14], (1, C3)),
    }

    x = jax.random.normal(keys[15], (N, C0, H, W), dtype=jnp.float32)

    out = resblock3_forward(x, params)
    out = jax.block_until_ready(out)

    ref = _ref_forward(x, params)
    assert out.shape == (N, C3, H, W), out.shape
    # Kernel matmuls use f32 operands with default MXU precision vs the
    # f32-HIGHEST reference; BN normalization amplifies rounding, so keep a
    # loose tolerance (structural bugs would produce O(1) differences).
    max_diff = float(jnp.max(jnp.abs(out - ref)))
    assert bool(jnp.allclose(out, ref, atol=5e-2, rtol=5e-2)), (
        "max abs diff = %e" % max_diff)

    print("KERNEL_OK")
</pallas_src>

<mosaic_0001>
module attributes {stable_mosaic.version = 11 : i64} {
  func.func @resblock3_kernel(%arg0: memref<4x512xf32, #tpu.memory_space<vmem>>, %arg1: memref<24x4xf32, #tpu.memory_space<vmem>>, %arg2: memref<8x72xf32, #tpu.memory_space<vmem>>, %arg3: memref<16x8xf32, #tpu.memory_space<vmem>>, %arg4: memref<48x2xf32, #tpu.memory_space<vmem>>, %arg5: memref<9x512xf32, #tpu.memory_space<vmem>>, %arg6: memref<16x512xf32, #tpu.memory_space<vmem>>, %arg7: memref<72x512xf32, #tpu.memory_space<vmem>>) attributes {dimension_semantics = [], scalar_prefetch = 0 : i64, scratch_operands = 1 : i64, tpu.core_type = #tpu.core_type<tc>} {
    %cst = arith.constant 1.000000e+00 : f32
    %0 = vector.broadcast %cst : f32 to vector<512x1xf32>
    %c0 = arith.constant 0 : index
    %c0_0 = arith.constant 0 : index
    %1 = vector.load %arg0[%c0, %c0_0] : memref<4x512xf32, #tpu.memory_space<vmem>>, vector<4x512xf32>
    %c0_1 = arith.constant 0 : index
    %c0_2 = arith.constant 0 : index
    %2 = vector.load %arg1[%c0_1, %c0_2] : memref<24x4xf32, #tpu.memory_space<vmem>>, vector<24x4xf32>
    %cst_3 = arith.constant dense<0.000000e+00> : vector<24x512xf32>
    %3 = tpu.matmul %2, %1, %cst_3 {dimension_numbers = #tpu.dot_dimension_numbers<[1], [0], [0], [1], [0, 0, 1, 1], [], []>} : vector<24x4xf32>, vector<4x512xf32>, vector<24x512xf32> -> vector<24x512xf32>
    %4 = vector.extract_strided_slice %3 {offsets = [0, 0], sizes = [8, 512], strides = [1, 1]} : vector<24x512xf32> to vector<8x512xf32>
    %5 = vector.extract_strided_slice %3 {offsets = [8, 0], sizes = [16, 512], strides = [1, 1]} : vector<24x512xf32> to vector<16x512xf32>
    %c0_4 = arith.constant 0 : index
    %c0_5 = arith.constant 0 : index
    %6 = vector.load %arg4[%c0_4, %c0_5] : memref<48x2xf32, #tpu.memory_space<vmem>>, vector<8x1xf32>
    %c0_6 = arith.constant 0 : index
    %c1 = arith.constant 1 : index
    %7 = vector.load %arg4[%c0_6, %c1] : memref<48x2xf32, #tpu.memory_space<vmem>>, vector<8x1xf32>
    %8 = arith.mulf %4, %4 : vector<8x512xf32>
    %9 = tpu.concatenate %4, %8 in 0 : vector<8x512xf32>, vector<8x512xf32> -> vector<16x512xf32>
    %cst_7 = arith.constant dense<0.000000e+00> : vector<16x1xf32>
    %10 = tpu.matmul %9, %0, %cst_7 {dimension_numbers = #tpu.dot_dimension_numbers<[1], [0], [0], [1], [0, 0, 1, 1], [], []>} : vector<16x512xf32>, vector<512x1xf32>, vector<16x1xf32> -> vector<16x1xf32>
    %11 = vector.extract_strided_slice %10 {offsets = [0, 0], sizes = [8, 1], strides = [1, 1]} : vector<16x1xf32> to vector<8x1xf32>
    %cst_8 = arith.constant 0.001953125 : f32
    %12 = vector.broadcast %cst_8 : f32 to vector<8x1xf32>
    %13 = arith.mulf %11, %12 : vector<8x1xf32>
    %14 = vector.extract_strided_slice %10 {offsets = [8, 0], sizes = [8, 1], strides = [1, 1]} : vector<16x1xf32> to vector<8x1xf32>
    %cst_9 = arith.constant 0.001953125 : f32
    %15 = vector.broadcast %cst_9 : f32 to vector<8x1xf32>
    %16 = arith.mulf %14, %15 : vector<8x1xf32>
    %17 = arith.mulf %13, %13 : vector<8x1xf32>
    %18 = arith.subf %16, %17 : vector<8x1xf32>
    %cst_10 = arith.constant 9.99999974E-6 : f32
    %19 = vector.broadcast %cst_10 : f32 to vector<8x1xf32>
    %20 = arith.addf %18, %19 : vector<8x1xf32>
    %21 = math.rsqrt %20 : vector<8x1xf32>
    %22 = arith.mulf %6, %21 : vector<8x1xf32>
    %23 = arith.mulf %13, %22 : vector<8x1xf32>
    %24 = arith.subf %7, %23 : vector<8x1xf32>
    %25 = vector.broadcast %22 : vector<8x1xf32> to vector<8x512xf32>
    %26 = arith.mulf %4, %25 : vector<8x512xf32>
    %27 = vector.broadcast %24 : vector<8x1xf32> to vector<8x512xf32>
    %28 = arith.addf %26, %27 : vector<8x512xf32>
    %cst_11 = arith.constant 0.000000e+00 : f32
    %29 = vector.broadcast %cst_11 : f32 to vector<8x512xf32>
    %30 = arith.maximumf %28, %29 : vector<8x512xf32>
    %c17_i32 = arith.constant 17 : i32
    %31 = tpu.dynamic_rotate %30 by %c17_i32 dim 1 : vector<8x512xf32>, i32 -> vector<8x512xf32>
    %c0_12 = arith.constant 0 : index
    %c0_13 = arith.constant 0 : index
    %32 = vector.load %arg5[%c0_12, %c0_13] : memref<9x512xf32, #tpu.memory_space<vmem>>, vector<1x512xf32>
    %33 = vector.broadcast %32 : vector<1x512xf32> to vector<8x512xf32>
    %34 = arith.mulf %31, %33 : vector<8x512xf32>
    %c0_14 = arith.constant 0 : index
    %c0_15 = arith.constant 0 : index
    %35 = vector.load %arg7[%c0_14, %c0_15] : memref<72x512xf32, #tpu.memory_space<vmem>>, vector<8x512xf32>
    tpu.vector_store %arg7[%c0_14, %c0_15], %34 {strides = array<i32>} : memref<72x512xf32, #tpu.memory_space<vmem>>, vector<8x512xf32>,
    %c16_i32 = arith.constant 16 : i32
    %36 = tpu.dynamic_rotate %30 by %c16_i32 dim 1 : vector<8x512xf32>, i32 -> vector<8x512xf32>
    %c1_16 = arith.constant 1 : index
    %c0_17 = arith.constant 0 : index
    %37 = vector.load %arg5[%c1_16, %c0_17] : memref<9x512xf32, #tpu.memory_space<vmem>>, vector<1x512xf32>
    %38 = vector.broadcast %37 : vector<1x512xf32> to vector<8x512xf32>
    %39 = arith.mulf %36, %38 : vector<8x512xf32>
    %c8 = arith.constant 8 : index
    %c0_18 = arith.constant 0 : index
    %40 = vector.load %arg7[%c8, %c0_18] : memref<72x512xf32, #tpu.memory_space<vmem>>, vector<8x512xf32>
    tpu.vector_store %arg7[%c8, %c0_18], %39 {strides = array<i32>} : memref<72x512xf32, #tpu.memory_space<vmem>>, vector<8x512xf32>,
    %c15_i32 = arith.constant 15 : i32
    %41 = tpu.dynamic_rotate %30 by %c15_i32 dim 1 : vector<8x512xf32>, i32 -> vector<8x512xf32>
    %c2 = arith.constant 2 : index
    %c0_19 = arith.constant 0 : index
    %42 = vector.load %arg5[%c2, %c0_19] : memref<9x512xf32, #tpu.memory_space<vmem>>, vector<1x512xf32>
    %43 = vector.broadcast %42 : vector<1x512xf32> to vector<8x512xf32>
    %44 = arith.mulf %41, %43 : vector<8x512xf32>
    %c16 = arith.constant 16 : index
    %c0_20 = arith.constant 0 : index
    %45 = vector.load %arg7[%c16, %c0_20] : memref<72x512xf32, #tpu.memory_space<vmem>>, vector<8x512xf32>
    tpu.vector_store %arg7[%c16, %c0_20], %44 {strides = array<i32>} : memref<72x512xf32, #tpu.memory_space<vmem>>, vector<8x512xf32>,
    %c1_i32 = arith.constant 1 : i32
    %46 = tpu.dynamic_rotate %30 by %c1_i32 dim 1 : vector<8x512xf32>, i32 -> vector<8x512xf32>
    %c3 = arith.constant 3 : index
    %c0_21 = arith.constant 0 : index
    %47 = vector.load %arg5[%c3, %c0_21] : memref<9x512xf32, #tpu.memory_space<vmem>>, vector<1x512xf32>
    %48 = vector.broadcast %47 : vector<1x512xf32> to vector<8x512xf32>
    %49 = arith.mulf %46, %48 : vector<8x512xf32>
    %c24 = arith.constant 24 : index
    %c0_22 = arith.constant 0 : index
    %50 = vector.load %arg7[%c24, %c0_22] : memref<72x512xf32, #tpu.memory_space<vmem>>, vector<8x512xf32>
    tpu.vector_store %arg7[%c24, %c0_22], %49 {strides = array<i32>} : memref<72x512xf32, #tpu.memory_space<vmem>>, vector<8x512xf32>,
    %c32 = arith.constant 32 : index
    %c0_23 = arith.constant 0 : index
    %51 = vector.load %arg7[%c32, %c0_23] : memref<72x512xf32, #tpu.memory_space<vmem>>, vector<8x512xf32>
    tpu.vector_store %arg7[%c32, %c0_23], %30 {strides = array<i32>} : memref<72x512xf32, #tpu.memory_space<vmem>>, vector<8x512xf32>,
    %c511_i32 = arith.constant 511 : i32
    %52 = tpu.dynamic_rotate %30 by %c511_i32 dim 1 : vector<8x512xf32>, i32 -> vector<8x512xf32>
    %c5 = arith.constant 5 : index
    %c0_24 = arith.constant 0 : index
    %53 = vector.load %arg5[%c5, %c0_24] : memref<9x512xf32, #tpu.memory_space<vmem>>, vector<1x512xf32>
    %54 = vector.broadcast %53 : vector<1x512xf32> to vector<8x512xf32>
    %55 = arith.mulf %52, %54 : vector<8x512xf32>
    %c40 = arith.constant 40 : index
    %c0_25 = arith.constant 0 : index
    %56 = vector.load %arg7[%c40, %c0_25] : memref<72x512xf32, #tpu.memory_space<vmem>>, vector<8x512xf32>
    tpu.vector_store %arg7[%c40, %c0_25], %55 {strides = array<i32>} : memref<72x512xf32, #tpu.memory_space<vmem>>, vector<8x512xf32>,
    %c497_i32 = arith.constant 497 : i32
    %57 = tpu.dynamic_rotate %30 by %c497_i32 dim 1 : vector<8x512xf32>, i32 -> vector<8x512xf32>
    %c6 = arith.constant 6 : index
    %c0_26 = arith.constant 0 : index
    %58 = vector.load %arg5[%c6, %c0_26] : memref<9x512xf32, #tpu.memory_space<vmem>>, vector<1x512xf32>
    %59 = vector.broadcast %58 : vector<1x512xf32> to vector<8x512xf32>
    %60 = arith.mulf %57, %59 : vector<8x512xf32>
    %c48 = arith.constant 48 : index
    %c0_27 = arith.constant 0 : index
    %61 = vector.load %arg7[%c48, %c0_27] : memref<72x512xf32, #tpu.memory_space<vmem>>, vector<8x512xf32>
    tpu.vector_store %arg7[%c48, %c0_27], %60 {strides = array<i32>} : memref<72x512xf32, #tpu.memory_space<vmem>>, vector<8x512xf32>,
    %c496_i32 = arith.constant 496 : i32
    %62 = tpu.dynamic_rotate %30 by %c496_i32 dim 1 : vector<8x512xf32>, i32 -> vector<8x512xf32>
    %c7 = arith.constant 7 : index
    %c0_28 = arith.constant 0 : index
    %63 = vector.load %arg5[%c7, %c0_28] : memref<9x512xf32, #tpu.memory_space<vmem>>, vector<1x512xf32>
    %64 = vector.broadcast %63 : vector<1x512xf32> to vector<8x512xf32>
    %65 = arith.mulf %62, %64 : vector<8x512xf32>
    %c56 = arith.constant 56 : index
    %c0_29 = arith.constant 0 : index
    %66 = vector.load %arg7[%c56, %c0_29] : memref<72x512xf32, #tpu.memory_space<vmem>>, vector<8x512xf32>
    tpu.vector_store %arg7[%c56, %c0_29], %65 {strides = array<i32>} : memref<72x512xf32, #tpu.memory_space<vmem>>, vector<8x512xf32>,
    %c495_i32 = arith.constant 495 : i32
    %67 = tpu.dynamic_rotate %30 by %c495_i32 dim 1 : vector<8x512xf32>, i32 -> vector<8x512xf32>
    %c8_30 = arith.constant 8 : index
    %c0_31 = arith.constant 0 : index
    %68 = vector.load %arg5[%c8_30, %c0_31] : memref<9x512xf32, #tpu.memory_space<vmem>>, vector<1x512xf32>
    %69 = vector.broadcast %68 : vector<1x512xf32> to vector<8x512xf32>
    %70 = arith.mulf %67, %69 : vector<8x512xf32>
    %c64 = arith.constant 64 : index
    %c0_32 = arith.constant 0 : index
    %71 = vector.load %arg7[%c64, %c0_32] : memref<72x512xf32, #tpu.memory_space<vmem>>, vector<8x512xf32>
    tpu.vector_store %arg7[%c64, %c0_32], %70 {strides = array<i32>} : memref<72x512xf32, #tpu.memory_space<vmem>>, vector<8x512xf32>,
    %c0_33 = arith.constant 0 : index
    %c0_34 = arith.constant 0 : index
    %72 = vector.load %arg2[%c0_33, %c0_34] : memref<8x72xf32, #tpu.memory_space<vmem>>, vector<8x72xf32>
    %c0_35 = arith.constant 0 : index
    %c0_36 = arith.constant 0 : index
    %73 = vector.load %arg7[%c0_35, %c0_36] : memref<72x512xf32, #tpu.memory_space<vmem>>, vector<72x512xf32>
    %cst_37 = arith.constant dense<0.000000e+00> : vector<8x512xf32>
    %74 = tpu.matmul %72, %73, %cst_37 {dimension_numbers = #tpu.dot_dimension_numbers<[1], [0], [0], [1], [0, 0, 1, 1], [], []>} : vector<8x72xf32>, vector<72x512xf32>, vector<8x512xf32> -> vector<8x512xf32>
    %c8_38 = arith.constant 8 : index
    %c0_39 = arith.constant 0 : index
    %75 = vector.load %arg4[%c8_38, %c0_39] : memref<48x2xf32, #tpu.memory_space<vmem>>, vector<8x1xf32>
    %c8_40 = arith.constant 8 : index
    %c1_41 = arith.constant 1 : index
    %76 = vector.load %arg4[%c8_40, %c1_41] : memref<48x2xf32, #tpu.memory_space<vmem>>, vector<8x1xf32>
    %77 = arith.mulf %74, %74 : vector<8x512xf32>
    %78 = tpu.concatenate %74, %77 in 0 : vector<8x512xf32>, vector<8x512xf32> -> vector<16x512xf32>
    %cst_42 = arith.constant dense<0.000000e+00> : vector<16x1xf32>
    %79 = tpu.matmul %78, %0, %cst_42 {dimension_numbers = #tpu.dot_dimension_numbers<[1], [0], [0], [1], [0, 0, 1, 1], [], []>} : vector<16x512xf32>, vector<512x1xf32>, vector<16x1xf32> -> vector<16x1xf32>
    %80 = vector.extract_strided_slice %79 {offsets = [0, 0], sizes = [8, 1], strides = [1, 1]} : vector<16x1xf32> to vector<8x1xf32>
    %cst_43 = arith.constant 0.001953125 : f32
    %81 = vector.broadcast %cst_43 : f32 to vector<8x1xf32>
    %82 = arith.mulf %80, %81 : vector<8x1xf32>
    %83 = vector.extract_strided_slice %79 {offsets = [8, 0], sizes = [8, 1], strides = [1, 1]} : vector<16x1xf32> to vector<8x1xf32>
    %cst_44 = arith.constant 0.001953125 : f32
    %84 = vector.broadcast %cst_44 : f32 to vector<8x1xf32>
    %85 = arith.mulf %83, %84 : vector<8x1xf32>
    %86 = arith.mulf %82, %82 : vector<8x1xf32>
    %87 = arith.subf %85, %86 : vector<8x1xf32>
    %cst_45 = arith.constant 9.99999974E-6 : f32
    %88 = vector.broadcast %cst_45 : f32 to vector<8x1xf32>
    %89 = arith.addf %87, %88 : vector<8x1xf32>
    %90 = math.rsqrt %89 : vector<8x1xf32>
    %91 = arith.mulf %75, %90 : vector<8x1xf32>
    %92 = arith.mulf %82, %91 : vector<8x1xf32>
    %93 = arith.subf %76, %92 : vector<8x1xf32>
    %94 = vector.broadcast %91 : vector<8x1xf32> to vector<8x512xf32>
    %95 = arith.mulf %74, %94 : vector<8x512xf32>
    %96 = vector.broadcast %93 : vector<8x1xf32> to vector<8x512xf32>
    %97 = arith.addf %95, %96 : vector<8x512xf32>
    %cst_46 = arith.constant 0.000000e+00 : f32
    %98 = vector.broadcast %cst_46 : f32 to vector<8x512xf32>
    %99 = arith.maximumf %97, %98 : vector<8x512xf32>
    %c0_47 = arith.constant 0 : index
    %c0_48 = arith.constant 0 : index
    %100 = vector.load %arg3[%c0_47, %c0_48] : memref<16x8xf32, #tpu.memory_space<vmem>>, vector<16x8xf32>
    %cst_49 = arith.constant dense<0.000000e+00> : vector<16x512xf32>
    %101 = tpu.matmul %100, %99, %cst_49 {dimension_numbers = #tpu.dot_dimension_numbers<[1], [0], [0], [1], [0, 0, 1, 1], [], []>} : vector<16x8xf32>, vector<8x512xf32>, vector<16x512xf32> -> vector<16x512xf32>
    %c16_50 = arith.constant 16 : index
    %c0_51 = arith.constant 0 : index
    %102 = vector.load %arg4[%c16_50, %c0_51] : memref<48x2xf32, #tpu.memory_space<vmem>>, vector<16x1xf32>
    %c16_52 = arith.constant 16 : index
    %c1_53 = arith.constant 1 : index
    %103 = vector.load %arg4[%c16_52, %c1_53] : memref<48x2xf32, #tpu.memory_space<vmem>>, vector<16x1xf32>
    %c32_54 = arith.constant 32 : index
    %c0_55 = arith.constant 0 : index
    %104 = vector.load %arg4[%c32_54, %c0_55] : memref<48x2xf32, #tpu.memory_space<vmem>>, vector<16x1xf32>
    %c32_56 = arith.constant 32 : index
    %c1_57 = arith.constant 1 : index
    %105 = vector.load %arg4[%c32_56, %c1_57] : memref<48x2xf32, #tpu.memory_space<vmem>>, vector<16x1xf32>
    %106 = arith.mulf %101, %101 : vector<16x512xf32>
    %107 = arith.mulf %5, %5 : vector<16x512xf32>
    %108 = tpu.concatenate %101, %106, %5, %107 in 0 : vector<16x512xf32>, vector<16x512xf32>, vector<16x512xf32>, vector<16x512xf32> -> vector<64x512xf32>
    %cst_58 = arith.constant dense<0.000000e+00> : vector<64x1xf32>
    %109 = tpu.matmul %108, %0, %cst_58 {dimension_numbers = #tpu.dot_dimension_numbers<[1], [0], [0], [1], [0, 0, 1, 1], [], []>} : vector<64x512xf32>, vector<512x1xf32>, vector<64x1xf32> -> vector<64x1xf32>
    %110 = vector.extract_strided_slice %109 {offsets = [0, 0], sizes = [32, 1], strides = [1, 1]} : vector<64x1xf32> to vector<32x1xf32>
    %111 = vector.extract_strided_slice %110 {offsets = [0, 0], sizes = [16, 1], strides = [1, 1]} : vector<32x1xf32> to vector<16x1xf32>
    %cst_59 = arith.constant 0.001953125 : f32
    %112 = vector.broadcast %cst_59 : f32 to vector<16x1xf32>
    %113 = arith.mulf %111, %112 : vector<16x1xf32>
    %114 = vector.extract_strided_slice %110 {offsets = [16, 0], sizes = [16, 1], strides = [1, 1]} : vector<32x1xf32> to vector<16x1xf32>
    %cst_60 = arith.constant 0.001953125 : f32
    %115 = vector.broadcast %cst_60 : f32 to vector<16x1xf32>
    %116 = arith.mulf %114, %115 : vector<16x1xf32>
    %117 = arith.mulf %113, %113 : vector<16x1xf32>
    %118 = arith.subf %116, %117 : vector<16x1xf32>
    %cst_61 = arith.constant 9.99999974E-6 : f32
    %119 = vector.broadcast %cst_61 : f32 to vector<16x1xf32>
    %120 = arith.addf %118, %119 : vector<16x1xf32>
    %121 = math.rsqrt %120 : vector<16x1xf32>
    %122 = arith.mulf %102, %121 : vector<16x1xf32>
    %123 = arith.mulf %113, %122 : vector<16x1xf32>
    %124 = arith.subf %103, %123 : vector<16x1xf32>
    %125 = vector.extract_strided_slice %109 {offsets = [32, 0], sizes = [32, 1], strides = [1, 1]} : vector<64x1xf32> to vector<32x1xf32>
    %126 = vector.extract_strided_slice %125 {offsets = [0, 0], sizes = [16, 1], strides = [1, 1]} : vector<32x1xf32> to vector<16x1xf32>
    %cst_62 = arith.constant 0.001953125 : f32
    %127 = vector.broadcast %cst_62 : f32 to vector<16x1xf32>
    %128 = arith.mulf %126, %127 : vector<16x1xf32>
    %129 = vector.extract_strided_slice %125 {offsets = [16, 0], sizes = [16, 1], strides = [1, 1]} : vector<32x1xf32> to vector<16x1xf32>
    %cst_63 = arith.constant 0.001953125 : f32
    %130 = vector.broadcast %cst_63 : f32 to vector<16x1xf32>
    %131 = arith.mulf %129, %130 : vector<16x1xf32>
    %132 = arith.mulf %128, %128 : vector<16x1xf32>
    %133 = arith.subf %131, %132 : vector<16x1xf32>
    %cst_64 = arith.constant 9.99999974E-6 : f32
    %134 = vector.broadcast %cst_64 : f32 to vector<16x1xf32>
    %135 = arith.addf %133, %134 : vector<16x1xf32>
    %136 = math.rsqrt %135 : vector<16x1xf32>
    %137 = arith.mulf %104, %136 : vector<16x1xf32>
    %138 = arith.mulf %128, %137 : vector<16x1xf32>
    %139 = arith.subf %105, %138 : vector<16x1xf32>
    %140 = vector.broadcast %122 : vector<16x1xf32> to vector<16x512xf32>
    %141 = arith.mulf %101, %140 : vector<16x512xf32>
    %142 = vector.broadcast %124 : vector<16x1xf32> to vector<16x512xf32>
    %143 = arith.addf %141, %142 : vector<16x512xf32>
    %144 = vector.broadcast %137 : vector<16x1xf32> to vector<16x512xf32>
    %145 = arith.mulf %5, %144 : vector<16x512xf32>
    %146 = arith.addf %143, %145 : vector<16x512xf32>
    %147 = vector.broadcast %139 : vector<16x1xf32> to vector<16x512xf32>
    %148 = arith.addf %146, %147 : vector<16x512xf32>
    %cst_65 = arith.constant 0.000000e+00 : f32
    %149 = vector.broadcast %cst_65 : f32 to vector<16x512xf32>
    %150 = arith.maximumf %148, %149 : vector<16x512xf32>
    %c0_66 = arith.constant 0 : index
    %c0_67 = arith.constant 0 : index
    %151 = vector.load %arg6[%c0_66, %c0_67] : memref<16x512xf32, #tpu.memory_space<vmem>>, vector<16x512xf32>
    tpu.vector_store %arg6[%c0_66, %c0_67], %150 {strides = array<i32>} : memref<16x512xf32, #tpu.memory_space<vmem>>, vector<16x512xf32>,
    return
  }
}

</mosaic_0001>

<bundles_post_ra>
// kernel: resblock3_forward.1
= control target key start
LH: loop header
LB: loop body
LE: loop exit
PB: predicated region body
PF: predicated region fallthrough
CT: control target
= control target key end

     0   :  { %vm47_vm0 = vcmask 1043456   ;;  %vm37_vm1 = vcmask 31744   ;;  %v1364_v7 = vmov 1.0   ;;  %v1365_v40 = vmov 0   ;;  %s1366_s7 = smov 1   ;;  %s1368_s8 = smov 111   ;;  %s2065_s0 = inlined_call_operand.vmem [shape: f32[4,512], index: 0, kind: input, shape index: {}]   ;;  %s2066_s1 = inlined_call_operand.vmem [shape: f32[24,4], index: 1, kind: input, shape index: {}]   ;;  %s2067_s4 = inlined_call_operand.vmem [shape: f32[48,2], index: 4, kind: input, shape index: {}]   ;;  %s2068_s5 = inlined_call_operand.vmem [shape: f32[9,512], index: 5, kind: input, shape index: {}]   ;;  %s2069_s2 = inlined_call_operand.vmem [shape: f32[8,72], index: 2, kind: input, shape index: {}]   ;;  %s2070_s3 = inlined_call_operand.vmem [shape: f32[16,8], index: 3, kind: input, shape index: {}]   ;;  %s2071_s6 = inlined_call_operand.vmem [shape: f32[16,512], index: 6, kind: output, shape index: {}]  }
   0x1   :  { %v24_v0 = vld [vmem:[%s2065_s0 + $0x8] sm:$0xff]  ;;  %v23_v1 = vld [vmem:[%s2065_s0] sm:$0xff]  ;;  %v27_v9 = vld [vmem:[%s2066_s1 + $0x10] sm:$0xff]  ;;  %1343 = vset.pattern.permute.xlu0 %v1365_v40  ;;  %v1367_v56 = vmov 1   ;;  %s1369_s9 = smov 113   ;;  %s1370_s10 = smov 127  }
   0x2   :  { %32 = vst [vmem:[#allocation1 + $0x10] ss:$2 sm:$0xff] %v24_v0  ;;  %v25_v2 = vld [vmem:[%s2066_s1] sm:$0xff]  ;;  %v26_v8 = vld [vmem:[%s2066_s1 + $0x8] sm:$0xff]  ;;  %1344 = vset.pattern.permute.xlu1 %v1367_v56  ;;  %1346 = vset.pattern.permute.xlu2 %v1367_v56  ;;  %s1371_s11 = smov 112   ;;  %s1372_s12 = smov 16  }
   0x3   :  { %30 = vst [vmem:[#allocation1] ss:$2 sm:$0xff] %v23_v1  ;;  %v160_v51 = vld [vmem:[%s2067_s4] sm:$0xff]  ;;  %s1373_s13 = smov 15   ;;  %s1374_s14 = smov 17   ;;  %vm599_vm13 = vcmask 588800  }
   0x9   :  { %v35_v3 = vld.sshfl [vmem:[#allocation1 + $0x10] sm:$0xff pattern:$0x75316420]  ;;  %v36_v4 = vld.sshfl [vmem:[#allocation1 + $0x18] sm:$0xff pattern:$0x75316420] }
   0xa   :  { %1305 = vmatpush.msk.msra.mxu2 %vm47_vm0, %v35_v3  ;;  %1309 = vmatpush.msk.msra.mxu3 %vm47_vm0, %v36_v4  ;;  %v33_v5 = vld.sshfl [vmem:[#allocation1] sm:$0xff pattern:$0x75316420]  ;;  %v34_v6 = vld.sshfl [vmem:[#allocation1 + $0x8] sm:$0xff pattern:$0x75316420] }
   0xb   :  { %1306 = vmatmul.msk.f32.vlgmr.msra.gmra.mxu2 %vm37_vm1, %v25_v2  ;;  %1310 = vmatmul.msk.f32.vlgmr.msra.gmra.mxu3 %vm37_vm1, %v25_v2 }
   0xc   :  { %1297 = vmatpush.msk.msra.mxu0 %vm47_vm0, %v33_v5  ;;  %1301 = vmatpush.msk.msra.mxu1 %vm47_vm0, %v34_v6 }
   0xd   :  { %1298 = vmatmul.msk.f32.vlgmr.msra.gmra.mxu0 %vm37_vm1, %v25_v2  ;;  %1302 = vmatmul.msk.f32.vlgmr.msra.gmra.mxu1 %vm37_vm1, %v25_v2 }
   0xe   :  { %165 = vmatpush.msrb.mxu0 %v1364_v7  ;;  %188 = vmatpush.msrb.mxu1 %v1364_v7 }
   0xf   :  { %211 = vmatpush.msrb.mxu2 %v1364_v7  ;;  %234 = vmatpush.msrb.mxu3 %v1364_v7 }
  0x10   :  { %166 = vmatpush.msrb.mxu0 %v1364_v7  ;;  %189 = vmatpush.msrb.mxu1 %v1364_v7 }
  0x11   :  { %212 = vmatpush.msrb.mxu2 %v1364_v7  ;;  %235 = vmatpush.msrb.mxu3 %v1364_v7 }
  0x12   :  { %167 = vmatpush.msrb.mxu0 %v1364_v7  ;;  %190 = vmatpush.msrb.mxu1 %v1364_v7 }
  0x13   :  { %213 = vmatpush.msrb.mxu2 %v1364_v7  ;;  %236 = vmatpush.msrb.mxu3 %v1364_v7 }
  0x14   :  { %168 = vmatpush.msrb.mxu0 %v1364_v7  ;;  %191 = vmatpush.msrb.mxu1 %v1364_v7 }
  0x15   :  { %214 = vmatpush.msrb.mxu2 %v1364_v7  ;;  %237 = vmatpush.msrb.mxu3 %v1364_v7 }
  0x16   :  { %169 = vmatpush.msrb.mxu0 %v1364_v7  ;;  %192 = vmatpush.msrb.mxu1 %v1364_v7 }
  0x17   :  { %215 = vmatpush.msrb.mxu2 %v1364_v7  ;;  %238 = vmatpush.msrb.mxu3 %v1364_v7 }
  0x18   :  { %170 = vmatpush.msrb.mxu0 %v1364_v7  ;;  %193 = vmatpush.msrb.mxu1 %v1364_v7 }
  0x19   :  { %216 = vmatpush.msrb.mxu2 %v1364_v7  ;;  %239 = vmatpush.msrb.mxu3 %v1364_v7 }
  0x1a   :  { %171 = vmatpush.msrb.mxu0 %v1364_v7  ;;  %194 = vmatpush.msrb.mxu1 %v1364_v7 }
  0x1b   :  { %217 = vmatpush.msrb.mxu2 %v1364_v7  ;;  %240 = vmatpush.msrb.mxu3 %v1364_v7 }
  0x1c   :  { %172 = vmatpush.msrb.mxu0 %v1364_v7  ;;  %195 = vmatpush.msrb.mxu1 %v1364_v7 }
  0x1d   :  { %1299 = vmatmul.msk.f32.gmra.mxu0 %vm37_vm1, %v26_v8  ;;  %1303 = vmatmul.msk.f32.gmra.mxu1 %vm37_vm1, %v26_v8 }
  0x1e   :  { %173 = vmatpush.msrb.mxu0 %v1364_v7  ;;  %196 = vmatpush.msrb.mxu1 %v1364_v7 }
  0x1f   :  { %218 = vmatpush.msrb.mxu2 %v1364_v7  ;;  %241 = vmatpush.msrb.mxu3 %v1364_v7 }
  0x20   :  { %1307 = vmatmul.msk.f32.gmra.mxu2 %vm37_vm1, %v26_v8  ;;  %1311 = vmatmul.msk.f32.gmra.mxu3 %vm37_vm1, %v26_v8 }
  0x21   :  { %174 = vmatpush.msrb.mxu0 %v1364_v7  ;;  %197 = vmatpush.msrb.mxu1 %v1364_v7 }
  0x22   :  { %219 = vmatpush.msrb.mxu2 %v1364_v7  ;;  %242 = vmatpush.msrb.mxu3 %v1364_v7 }
  0x23   :  { %175 = vmatpush.msrb.mxu0 %v1364_v7  ;;  %198 = vmatpush.msrb.mxu1 %v1364_v7 }
  0x24   :  { %220 = vmatpush.msrb.mxu2 %v1364_v7  ;;  %243 = vmatpush.msrb.mxu3 %v1364_v7 }
  0x25   :  { %176 = vmatpush.msrb.mxu0 %v1364_v7  ;;  %199 = vmatpush.msrb.mxu1 %v1364_v7 }
  0x26   :  { %221 = vmatpush.msrb.mxu2 %v1364_v7  ;;  %244 = vmatpush.msrb.mxu3 %v1364_v7 }
  0x27   :  { %1300 = vmatmul.msk.f32.gmra.mxu0 %vm37_vm1, %v27_v9  ;;  %1304 = vmatmul.msk.f32.gmra.mxu1 %vm37_vm1, %v27_v9 }
  0x28   :  { %177 = vmatpush.msrb.mxu0 %v1364_v7  ;;  %200 = vmatpush.msrb.mxu1 %v1364_v7 }
  0x29   :  { %222 = vmatpush.msrb.mxu2 %v1364_v7  ;;  %245 = vmatpush.msrb.mxu3 %v1364_v7 }
  0x2a   :  { %1308 = vmatmul.msk.f32.gmra.mxu2 %vm37_vm1, %v27_v9  ;;  %1312 = vmatmul.msk.f32.gmra.mxu3 %vm37_vm1, %v27_v9  ;;  %vm826_vm1 = vcmask 64512  }
  0x2b   :  { %178 = vmatpush.msrb.mxu0 %v1364_v7  ;;  %201 = vmatpush.msrb.mxu1 %v1364_v7 }
  0x2c   :  { %223 = vmatpush.msrb.mxu2 %v1364_v7  ;;  %246 = vmatpush.msrb.mxu3 %v1364_v7 }
  0x2d   :  { %179 = vmatpush.msrb.mxu0 %v1364_v7  ;;  %202 = vmatpush.msrb.mxu1 %v1364_v7 }
  0x2e   :  { %224 = vmatpush.msrb.mxu2 %v1364_v7  ;;  %247 = vmatpush.msrb.mxu3 %v1364_v7 }
  0x2f   :  { %180 = vmatpush.msrb.mxu0 %v1364_v7  ;;  %203 = vmatpush.msrb.mxu1 %v1364_v7 }
  0x30   :  { %225 = vmatpush.msrb.mxu2 %v1364_v7  ;;  %248 = vmatpush.msrb.mxu3 %v1364_v7 }
  0x32   :  { %226 = vmatpush.msrb.mxu2 %v1364_v7  ;;  %249 = vmatpush.msrb.mxu3 %v1364_v7 }
  0x8a   :  { %v1501_v10 = vpop.f32.mrf.mxu0  ;;  %v1503_v11 = vpop.f32.mrf.mxu1 }
  0x8b   :  { %181 = vmatmul.f32.vlgmr.msrb.gmra.mxu0 %v1501_v10  ;;  %204 = vmatmul.f32.vlgmr.msrb.gmra.mxu1 %v1503_v11  ;;  %v161_v14 = vmul.f32 %v1501_v10, %v1501_v10  ;;  %v162_v15 = vmul.f32 %v1503_v11, %v1503_v11 }
  0x8e   :  { %v1507_v12 = vpop.f32.mrf.mxu2  ;;  %v1509_v13 = vpop.f32.mrf.mxu3 }
  0x8f   :  { %227 = vmatmul.f32.vlgmr.msrb.gmra.mxu2 %v1507_v12  ;;  %250 = vmatmul.f32.vlgmr.msrb.gmra.mxu3 %v1509_v13  ;;  %v163_v16 = vmul.f32 %v1507_v12, %v1507_v12  ;;  %v164_v17 = vmul.f32 %v1509_v13, %v1509_v13 }
  0x93   :  { %184 = vmatmul.f32.gmra.mxu0 %v161_v14  ;;  %207 = vmatmul.f32.gmra.mxu1 %v162_v15  ;;  %v1319_v14 = vld [vmem:[%s2068_s5 + $0x20] ss:$8 sm:$0xf] }
  0x94   :  { %v549_v15 = vperm.slane %v1319_v14, 3 }
  0x97   :  { %230 = vmatmul.f32.gmra.mxu2 %v163_v16  ;;  %253 = vmatmul.f32.gmra.mxu3 %v164_v17 }
  0x9a   :  { %v1521_v18 = vpop.f32.mrf.mxu0  ;;  %v1523_v19 = vpop.f32.mrf.mxu1 }
  0xa3   :  { %v1525_v20 = vpop.f32.mrf.mxu2  ;;  %v1527_v21 = vpop.f32.mrf.mxu3 }
  0xa4   :  { %v1529_v22 = vpop.f32.mrf.mxu0  ;;  %v1531_v23 = vpop.f32.mrf.mxu1 }
  0xad   :  { %v1533_v24 = vpop.f32.mrf.mxu2  ;;  %v1535_v25 = vpop.f32.mrf.mxu3 }
 0x108   :  { %v182_v26 = vpop.f32.mrf.mxu0  ;;  %v205_v27 = vpop.f32.mrf.mxu1 }
 0x109   :  { %v206_v28 = vadd.f32 %v205_v27, %v182_v26  ;;  %v548_v27 = vperm.slane %v1319_v14, 2 }
 0x110   :  { %v185_v32 = vpop.f32.mrf.mxu0  ;;  %v208_v33 = vpop.f32.mrf.mxu1 }
 0x111   :  { %v209_v35 = vadd.f32 %v208_v33, %v185_v32  ;;  %v1617_v33 = vld [vmem:[%s2068_s5 + $0x7] ss:$8 sm:$0xf] }
 0x112   :  { %v228_v29 = vpop.f32.mrf.mxu2  ;;  %v251_v30 = vpop.f32.mrf.mxu3 }
 0x113   :  { %v229_v31 = vadd.f32 %v228_v29, %v206_v28 }
 0x115   :  { %v252_v34 = vadd.f32 %v251_v30, %v229_v31 }
 0x117   :  { %v257_v37 = vmul.f32 0.001953125, %v252_v34  ;;  %v516_v34 = vperm.slane %v1617_v33, 2 }
 0x119   :  { %v259_v42 = vmul.f32 %v257_v37, %v257_v37 }
 0x11a   :  { %v231_v36 = vpop.f32.mrf.mxu2  ;;  %v254_v39 = vpop.f32.mrf.mxu3 }
 0x11b   :  { %v232_v38 = vadd.f32 %v231_v36, %v209_v35  ;;  %v517_v35 = vperm.slane %v1617_v33, 3 }
 0x11d   :  { %v255_v41 = vadd.f32 %v254_v39, %v232_v38 }
 0x11f   :  { %v258_v43 = vmul.f32 0.001953125, %v255_v41 }
 0x121   :  { %v260_v44 = vsub.f32 %v258_v43, %v259_v42 }
 0x123   :  { %v261_v45 = vadd.f32 1e-05, %v260_v44  ;;  %v1635_v44 = vld [vmem:[%s2068_s5 + $0x6] ss:$8 sm:$0xf] }
 0x125   :  { %1352 = vrsqrt.f32 %v261_v45  ;;  %vm268_vm3 = vweird.f32 %v261_v45 }
 0x12b   :  { %v1353_v46 = vpop.eup %1352 }
 0x12c   :  { %v263_v47 = vmul.f32 %v1353_v46, %v261_v45  ;;  %vm269_vm2 = vweird.f32 %v1353_v46  ;;  %v484_v45 = vperm.slane %v1635_v44, 2 }
 0x12d   :  { %vm270_vm4 = vmor %vm268_vm3, %vm269_vm2 }
 0x12e   :  { %v264_v48 = vmul.f32 %v1353_v46, %v263_v47 }
 0x130   :  { %v265_v49 = vmul.f32 0.5, %v264_v48 }
 0x132   :  { %v266_v50 = vsub.f32 1.5, %v265_v49 }
 0x134   :  { %v267_v52 = vmul.f32 %v1353_v46, %v266_v50 }
 0x136   :  { %v271_v53 = vsel %vm270_vm4, %v1353_v46, %v267_v52  ;;  %v485_v46 = vperm.slane %v1635_v44, 3 }
 0x137   :  { %v272_v54 = vmul.f32 %v271_v53, %v160_v51 }
 0x139   :  { %v273_v55 = vmul.f32 %v272_v54, %v257_v37 }
 0x13b   :  { %275 = vrot.lane.b32.xlu0 %v273_v55, %s1366_s7  ;;  %v546_v55 = vperm.slane %v1319_v14, 0 }
 0x143   :  { %281 = vperm.xlu0 %1343, %v272_v54   ;;  %v1651_v54 = vld [vmem:[%s2068_s5 + $0x5] ss:$8 sm:$0xf] }
 0x14b   :  { %1348 = vset.pattern.permute.xlu0 %v1367_v56 }
 0x1ad   :  { %v276_v57 = vpop.permute.xlu0 %275 }
 0x1ae   :  { %v278_v58 = vsub.f32 %v160_v51, %v276_v57  ;;  %v547_v57 = vperm.slane %v1319_v14, 1  ;;  %v1671_v14 = vld [vmem:[%s2068_s5 + $0x3] ss:$8 sm:$0xf] }
 0x1b0   :  { %290 = vperm.xlu1 %1344, %v278_v58   ;;  %v452_v58 = vperm.slane %v1651_v54, 2 }
 0x1b5   :  { %v282_v59 = vpop.permute.xlu0 %281 }
 0x1b6   :  { %v286_v60 = vmul.f32 %v282_v59, %v1507_v12  ;;  %v287_v61 = vmul.f32 %v282_v59, %v1509_v13  ;;  %v284_v3 = vmul.f32 %v282_v59, %v1501_v10  ;;  %v285_v6 = vmul.f32 %v282_v59, %v1503_v11 }
 0x1b7   :  { %v309_v11 = vlaneseq  ;;  %v453_v59 = vperm.slane %v1651_v54, 3 }
 0x1b8   :  { %1345 = vset.pattern.permute.xlu1 %v1365_v40 }
 0x1b9   :  { %v1600_v13 = vand.u32 127, %v309_v11 }
 0x1bb   :  { %vm538_vm5 = vcmp.lt.s32.totalorder %v1600_v13, 111  ;;  %vm506_vm6 = vcmp.lt.s32.totalorder %v1600_v13, 112  ;;  %vm474_vm7 = vcmp.lt.s32.totalorder %v1600_v13, 113  ;;  %vm442_vm8 = vcmp.lt.s32.totalorder %v1600_v13, 127 }
 0x1bc   :  { %vm406_vm9 = vcmp.lt.s32.totalorder %v1600_v13, 1  ;;  %vm374_vm10 = vcmp.lt.s32.totalorder %v1600_v13, 15  ;;  %vm342_vm11 = vcmp.lt.s32.totalorder %v1600_v13, 16  ;;  %vm311_vm12 = vcmp.lt.s32.totalorder %v1600_v13, 17 }
 0x222   :  { %v291_v62 = vpop.permute.xlu1 %290 }
 0x223   :  { %v295_v63 = vadd.f32 %v291_v62, %v286_v60  ;;  %v296_v0 = vadd.f32 %v291_v62, %v287_v61  ;;  %v293_v4 = vadd.f32 %v291_v62, %v284_v3  ;;  %v294_v8 = vadd.f32 %v291_v62, %v285_v6 }
 0x225   :  { %v1548_v1 = vmax.f32 %v295_v63, 0.0  ;;  %v1550_v2 = vmax.f32 %v296_v0, 0.0  ;;  %v1560_v5 = vmax.f32 %v293_v4, 0.0  ;;  %v1567_v9 = vmax.f32 %v294_v8, 0.0 }
 0x227   :  { %536 = vrot.lane.b32.xlu2 %v1550_v2, %s1368_s8  ;;  %470 = vrot.lane.b32.xlu0 %v1548_v1, %s1369_s9 }
 0x228   :  { %534 = vrot.lane.b32.xlu1 %v1548_v1, %s1368_s8 }
 0x22f   :  { %438 = vrot.lane.b32.xlu0 %v1548_v1, %s1370_s10  ;;  %502 = vrot.lane.b32.xlu2 %v1548_v1, %s1371_s11 }
 0x230   :  { %504 = vrot.lane.b32.xlu1 %v1550_v2, %s1371_s11 }
 0x237   :  { %434 = vrot.lane.b32.xlu0 %v1560_v5, %s1370_s10  ;;  %530 = vrot.lane.b32.xlu2 %v1560_v5, %s1368_s8 }
 0x238   :  { %472 = vrot.lane.b32.xlu1 %v1550_v2, %s1369_s9 }
 0x23f   :  { %532 = vrot.lane.b32.xlu0 %v1567_v9, %s1368_s8  ;;  %498 = vrot.lane.b32.xlu2 %v1560_v5, %s1371_s11 }
 0x240   :  { %440 = vrot.lane.b32.xlu1 %v1550_v2, %s1370_s10 }
 0x247   :  { %404 = vrot.lane.b32.xlu0 %v1550_v2, %s1366_s7  ;;  %466 = vrot.lane.b32.xlu2 %v1560_v5, %s1369_s9 }
 0x248   :  { %400 = vrot.lane.b32.xlu1 %v1567_v9, %s1366_s7 }
 0x24f   :  { %338 = vrot.lane.b32.xlu0 %v1548_v1, %s1372_s12  ;;  %402 = vrot.lane.b32.xlu2 %v1548_v1, %s1366_s7 }
 0x250   :  { %368 = vrot.lane.b32.xlu1 %v1567_v9, %s1373_s13 }
 0x257   :  { %303 = vrot.lane.b32.xlu0 %v1567_v9, %s1374_s14  ;;  %370 = vrot.lane.b32.xlu2 %v1548_v1, %s1373_s13 }
 0x258   :  { %500 = vrot.lane.b32.xlu1 %v1567_v9, %s1371_s11 }
 0x25f   :  { %436 = vrot.lane.b32.xlu0 %v1567_v9, %s1370_s10  ;;  %336 = vrot.lane.b32.xlu2 %v1567_v9, %s1372_s12 }
 0x260   :  { %372 = vrot.lane.b32.xlu1 %v1550_v2, %s1373_s13 }
 0x267   :  { %366 = vrot.lane.b32.xlu0 %v1560_v5, %s1373_s13  ;;  %468 = vrot.lane.b32.xlu2 %v1567_v9, %s1369_s9 }
 0x268   :  { %305 = vrot.lane.b32.xlu1 %v1548_v1, %s1374_s14 }
 0x26f   :  { %340 = vrot.lane.b32.xlu2 %v1550_v2, %s1372_s12 }
 0x270   :  { %307 = vrot.lane.b32.xlu1 %v1550_v2, %s1374_s14 }
 0x277   :  { %398 = vrot.lane.b32.xlu2 %v1560_v5, %s1366_s7 }
 0x278   :  { %334 = vrot.lane.b32.xlu1 %v1560_v5, %s1372_s12 }
 0x27f   :  { %301 = vrot.lane.b32.xlu2 %v1560_v5, %s1374_s14 }
 0x281   :  { %v537_v10 = vpop.permute.xlu2 %536 }
 0x289   :  { %v1598_v12 = vpop.permute.xlu2 %502 }
 0x291   :  { %v531_v16 = vpop.permute.xlu2 %530 }
 0x292   :  { %v542_v17 = vsel %vm538_vm5, %v537_v10, %v531_v16 }
 0x293   :  { %v557_v26 = vmul.f32 %v549_v15, %v542_v17  ;;  %v417_v15 = vperm.slane %v1671_v14, 3 }
 0x295   :  { %670 = vmatpush.msra.mxu3 %v557_v26 }
 0x299   :  { %v1608_v28 = vpop.permute.xlu0 %470  ;;  %v1610_v29 = vpop.permute.xlu2 %498 }
 0x29a   :  { %v535_v30 = vpop.permute.xlu1 %534 }
 0x29b   :  { %v539_v31 = vsel %vm538_vm5, %v535_v30, %v537_v10 }
 0x29c   :  { %v556_v32 = vmul.f32 %v548_v27, %v539_v31 }
 0x29e   :  { %650 = vmatpush.msra.mxu2 %v556_v32 }
 0x2a1   :  { %v1622_v36 = vpop.permute.xlu0 %438  ;;  %v1624_v37 = vpop.permute.xlu2 %466 }
 0x2a2   :  { %v505_v38 = vpop.permute.xlu1 %504 }
 0x2a3   :  { %v507_v39 = vsel %vm506_vm6, %v1598_v12, %v505_v38  ;;  %v510_v41 = vsel %vm506_vm6, %v505_v38, %v1610_v29 }
 0x2a4   :  { %v524_v42 = vmul.f32 %v516_v34, %v507_v39  ;;  %v525_v43 = vmul.f32 %v517_v35, %v510_v41 }
 0x2a6   :  { %651 = vmatpush.msra.mxu2 %v524_v42  ;;  %671 = vmatpush.msra.mxu3 %v525_v43 }
 0x2a9   :  { %v1640_v47 = vpop.permute.xlu0 %434  ;;  %v403_v48 = vpop.permute.xlu2 %402 }
 0x2aa   :  { %v473_v49 = vpop.permute.xlu1 %472 }
 0x2ab   :  { %v475_v50 = vsel %vm474_vm7, %v1608_v28, %v473_v49  ;;  %v478_v51 = vsel %vm474_vm7, %v473_v49, %v1624_v37  ;;  %v514_v49 = vperm.slane %v1617_v33, 0 }
 0x2ac   :  { %v492_v52 = vmul.f32 %v484_v45, %v475_v50  ;;  %v493_v53 = vmul.f32 %v485_v46, %v478_v51  ;;  %v515_v50 = vperm.slane %v1617_v33, 1 }
 0x2ae   :  { %652 = vmatpush.msra.mxu2 %v492_v52  ;;  %672 = vmatpush.msra.mxu3 %v493_v53  ;;  %v482_v53 = vperm.slane %v1635_v44, 0 }
 0x2b1   :  { %v533_v60 = vpop.permute.xlu0 %532  ;;  %v1656_v61 = vpop.permute.xlu2 %370 }
 0x2b2   :  { %v441_v62 = vpop.permute.xlu1 %440  ;;  %v540_v63 = vsel %vm538_vm5, %v533_v60, %v535_v30  ;;  %v541_v0 = vsel %vm538_vm5, %v531_v16, %v533_v60  ;;  %v416_v16 = vperm.slane %v1671_v14, 2 }
 0x2b3   :  { %v443_v3 = vsel %vm442_vm8, %v1622_v36, %v441_v62  ;;  %v446_v4 = vsel %vm442_vm8, %v441_v62, %v1640_v47  ;;  %v554_v6 = vmul.f32 %v546_v55, %v541_v0  ;;  %v555_v8 = vmul.f32 %v547_v57, %v540_v63 }
 0x2b4   :  { %v460_v10 = vmul.f32 %v452_v58, %v443_v3  ;;  %v461_v11 = vmul.f32 %v453_v59, %v446_v4  ;;  %v483_v55 = vperm.slane %v1635_v44, 1  ;;  %v451_v3 = vperm.slane %v1651_v54, 1 }
 0x2b5   :  { %610 = vmatpush.msra.mxu0 %v554_v6  ;;  %630 = vmatpush.msra.mxu1 %v555_v8 }
 0x2b6   :  { %653 = vmatpush.msra.mxu2 %v460_v10  ;;  %673 = vmatpush.msra.mxu3 %v461_v11  ;;  %v414_v11 = vperm.slane %v1671_v14, 0 }
 0x2b8   :  { %654 = vmatpush.msra.mxu2 %v1548_v1  ;;  %674 = vmatpush.msra.mxu3 %v1550_v2  ;;  %v1687_v1 = vld [vmem:[%s2068_s5 + $0x2] ss:$8 sm:$0xf]  ;;  %v1692_v2 = vld [vmem:[%s2068_s5 + $0x1] ss:$8 sm:$0xf] }
 0x2b9   :  { %v405_v17 = vpop.permute.xlu0 %404  ;;  %v1678_v26 = vpop.permute.xlu2 %336  ;;  %v384_v35 = vperm.slane %v1687_v1, 2  ;;  %v352_v42 = vperm.slane %v1692_v2, 2 }
 0x2ba   :  { %v401_v27 = vpop.permute.xlu1 %400  ;;  %v407_v30 = vsel %vm406_vm9, %v403_v48, %v405_v17 }
 0x2bb   :  { %v408_v31 = vsel %vm406_vm9, %v401_v27, %v403_v48  ;;  %v425_v32 = vmul.f32 %v417_v15, %v407_v30 }
 0x2bc   :  { %v424_v34 = vmul.f32 %v416_v16, %v408_v31 }
 0x2bd   :  { %675 = vmatpush.msra.mxu3 %v425_v32 }
 0x2be   :  { %655 = vmatpush.msra.mxu2 %v424_v34 }
 0x2c1   :  { %v339_v38 = vpop.permute.xlu0 %338  ;;  %v469_v39 = vpop.permute.xlu2 %468 }
 0x2c2   :  { %v1697_v41 = vpop.permute.xlu1 %368  ;;  %v344_v45 = vsel %vm342_vm11, %v1678_v26, %v339_v38  ;;  %v476_v58 = vsel %vm474_vm7, %v469_v39, %v1608_v28  ;;  %v477_v59 = vsel %vm474_vm7, %v1624_v37, %v469_v39  ;;  %v450_v28 = vperm.slane %v1651_v54, 0 }
 0x2c3   :  { %v376_v43 = vsel %vm374_vm10, %v1697_v41, %v1656_v61  ;;  %v360_v48 = vmul.f32 %v352_v42, %v344_v45  ;;  %v490_v44 = vmul.f32 %v482_v53, %v477_v59  ;;  %v491_v0 = vmul.f32 %v483_v55, %v476_v58 }
 0x2c4   :  { %v392_v46 = vmul.f32 %v384_v35, %v376_v43  ;;  %v385_v37 = vperm.slane %v1687_v1, 3  ;;  %v415_v54 = vperm.slane %v1671_v14, 1  ;;  %v316_v14 = vld [vmem:[%s2068_s5] ss:$8 sm:$0xf]  ;;  %v351_v58 = vperm.slane %v1692_v2, 1 }
 0x2c5   :  { %v319_v59 = vperm.slane %v316_v14, 1 }
 0x2c6   :  { %656 = vmatpush.msra.mxu2 %v392_v46 }
 0x2c8   :  { %657 = vmatpush.msra.mxu2 %v360_v48  ;;  %v562_v48 = vld [vmem:[%s2069_s2] sm:$0xff] }
 0x2c9   :  { %v1709_v51 = vpop.permute.xlu0 %303  ;;  %v1711_v52 = vpop.permute.xlu2 %340 }
 0x2ca   :  { %v501_v57 = vpop.permute.xlu1 %500  ;;  %v343_v15 = vsel %vm342_vm11, %v339_v38, %v1711_v52 }
 0x2cb   :  { %v508_v33 = vsel %vm506_vm6, %v501_v57, %v1598_v12  ;;  %v509_v60 = vsel %vm506_vm6, %v1610_v29, %v501_v57  ;;  %v353_v12 = vperm.slane %v1692_v2, 3  ;;  %v350_v57 = vperm.slane %v1692_v2, 0 }
 0x2cc   :  { %v522_v62 = vmul.f32 %v514_v49, %v509_v60  ;;  %v523_v63 = vmul.f32 %v515_v50, %v508_v33  ;;  %v318_v33 = vperm.slane %v316_v14, 0 }
 0x2cd   :  { %v361_v34 = vmul.f32 %v353_v12, %v343_v15 }
 0x2ce   :  { %611 = vmatpush.msra.mxu0 %v522_v62  ;;  %631 = vmatpush.msra.mxu1 %v523_v63 }
 0x2d0   :  { %612 = vmatpush.msra.mxu0 %v490_v44  ;;  %632 = vmatpush.msra.mxu1 %v491_v0 }
 0x2d1   :  { %v437_v4 = vpop.permute.xlu0 %436  ;;  %v399_v6 = vpop.permute.xlu2 %398 }
 0x2d2   :  { %v373_v8 = vpop.permute.xlu1 %372  ;;  %v444_v29 = vsel %vm442_vm8, %v437_v4, %v1622_v36  ;;  %v445_v10 = vsel %vm442_vm8, %v1640_v47, %v437_v4  ;;  %v409_v36 = vsel %vm406_vm9, %v399_v6, %v401_v27  ;;  %v410_v47 = vsel %vm406_vm9, %v405_v17, %v399_v6 }
 0x2d3   :  { %v375_v16 = vsel %vm374_vm10, %v1656_v61, %v373_v8  ;;  %v458_v30 = vmul.f32 %v450_v28, %v445_v10  ;;  %v459_v31 = vmul.f32 %v451_v3, %v444_v29  ;;  %v422_v35 = vmul.f32 %v414_v11, %v410_v47 }
 0x2d4   :  { %v393_v32 = vmul.f32 %v385_v37, %v375_v16  ;;  %v423_v38 = vmul.f32 %v415_v54, %v409_v36  ;;  %v382_v61 = vperm.slane %v1687_v1, 0  ;;  %v383_v27 = vperm.slane %v1687_v1, 1 }
 0x2d5   :  { %613 = vmatpush.msra.mxu0 %v458_v30  ;;  %633 = vmatpush.msra.mxu1 %v459_v31  ;;  %v320_v17 = vperm.slane %v316_v14, 2 }
 0x2d6   :  { %676 = vmatpush.msra.mxu3 %v393_v32 }
 0x2d7   :  { %614 = vmatpush.msra.mxu0 %v1560_v5  ;;  %634 = vmatpush.msra.mxu1 %v1567_v9 }
 0x2d8   :  { %677 = vmatpush.msra.mxu3 %v361_v34 }
 0x2d9   :  { %v367_v39 = vpop.permute.xlu0 %366  ;;  %615 = vmatpush.msra.mxu0 %v422_v35  ;;  %635 = vmatpush.msra.mxu1 %v423_v38  ;;  %v302_v55 = vpop.permute.xlu2 %301 }
 0x2da   :  { %v306_v42 = vpop.permute.xlu1 %305  ;;  %v377_v43 = vsel %vm374_vm10, %v367_v39, %v1697_v41  ;;  %v378_v5 = vsel %vm374_vm10, %v373_v8, %v367_v39  ;;  %v321_v41 = vperm.slane %v316_v14, 3  ;;  %v314_v62 = vsel %vm311_vm12, %v302_v55, %v1709_v51 }
 0x2db   :  { %v313_v9 = vsel %vm311_vm12, %v1709_v51, %v306_v42  ;;  %v390_v1 = vmul.f32 %v382_v61, %v378_v5  ;;  %v391_v45 = vmul.f32 %v383_v27, %v377_v43  ;;  %v327_v3 = vmul.f32 %v319_v59, %v314_v62 }
 0x2dc   :  { %v328_v46 = vmul.f32 %v320_v17, %v313_v9 }
 0x2dd   :  { %616 = vmatpush.msra.mxu0 %v390_v1  ;;  %636 = vmatpush.msra.mxu1 %v391_v45  ;;  %v683_v45 = vld [vmem:[%s2067_s4 + $0x8] sm:$0xff] }
 0x2de   :  { %658 = vmatpush.msra.mxu2 %v328_v46 }
 0x2df   :  { %1322 = vmatmul.msk.f32.vlgmr.msra.gmra.mxu2 %vm599_vm13, %v562_v48 }
 0x2e0   :  { %734 = vmatpush.msrb.mxu2 %v1364_v7 }
 0x2e2   :  { %v308_v49 = vpop.permute.xlu1 %307  ;;  %735 = vmatpush.msrb.mxu2 %v1364_v7 }
 0x2e3   :  { %v312_v50 = vsel %vm311_vm12, %v306_v42, %v308_v49  ;;  %v315_v63 = vsel %vm311_vm12, %v308_v49, %v302_v55 }
 0x2e4   :  { %v329_v53 = vmul.f32 %v321_v41, %v312_v50  ;;  %736 = vmatpush.msrb.mxu2 %v1364_v7  ;;  %v326_v37 = vmul.f32 %v318_v33, %v315_v63 }
 0x2e6   :  { %678 = vmatpush.msra.mxu3 %v329_v53  ;;  %737 = vmatpush.msrb.mxu2 %v1364_v7 }
 0x2e7   :  { %1323 = vmatmul.msk.f32.vlgmr.msra.gmra.mxu3 %vm599_vm13, %v562_v48 }
 0x2e8   :  { %757 = vmatpush.msrb.mxu3 %v1364_v7  ;;  %738 = vmatpush.msrb.mxu2 %v1364_v7 }
 0x2ea   :  { %v335_v60 = vpop.permute.xlu1 %334  ;;  %758 = vmatpush.msrb.mxu3 %v1364_v7  ;;  %739 = vmatpush.msrb.mxu2 %v1364_v7 }
 0x2eb   :  { %v345_v2 = vsel %vm342_vm11, %v335_v60, %v1678_v26  ;;  %v346_v44 = vsel %vm342_vm11, %v1711_v52, %v335_v60 }
 0x2ec   :  { %v358_v0 = vmul.f32 %v350_v57, %v346_v44  ;;  %v359_v28 = vmul.f32 %v351_v58, %v345_v2  ;;  %759 = vmatpush.msrb.mxu3 %v1364_v7  ;;  %740 = vmatpush.msrb.mxu2 %v1364_v7 }
 0x2ee   :  { %617 = vmatpush.msra.mxu0 %v358_v0  ;;  %637 = vmatpush.msra.mxu1 %v359_v28 }
 0x2ef   :  { %760 = vmatpush.msrb.mxu3 %v1364_v7  ;;  %741 = vmatpush.msrb.mxu2 %v1364_v7 }
 0x2f0   :  { %618 = vmatpush.msra.mxu0 %v326_v37  ;;  %638 = vmatpush.msra.mxu1 %v327_v3 }
 0x2f1   :  { %1320 = vmatmul.msk.f32.vlgmr.msra.gmra.mxu0 %vm599_vm13, %v562_v48  ;;  %1321 = vmatmul.msk.f32.vlgmr.msra.gmra.mxu1 %vm599_vm13, %v562_v48 }
 0x2f2   :  { %688 = vmatpush.msrb.mxu0 %v1364_v7  ;;  %711 = vmatpush.msrb.mxu1 %v1364_v7 }
 0x2f3   :  { %761 = vmatpush.msrb.mxu3 %v1364_v7  ;;  %742 = vmatpush.msrb.mxu2 %v1364_v7 }
 0x2f4   :  { %689 = vmatpush.msrb.mxu0 %v1364_v7  ;;  %712 = vmatpush.msrb.mxu1 %v1364_v7 }
 0x2f5   :  { %762 = vmatpush.msrb.mxu3 %v1364_v7  ;;  %743 = vmatpush.msrb.mxu2 %v1364_v7 }
 0x2f6   :  { %690 = vmatpush.msrb.mxu0 %v1364_v7  ;;  %713 = vmatpush.msrb.mxu1 %v1364_v7 }
 0x2f7   :  { %763 = vmatpush.msrb.mxu3 %v1364_v7  ;;  %744 = vmatpush.msrb.mxu2 %v1364_v7 }
 0x2f8   :  { %691 = vmatpush.msrb.mxu0 %v1364_v7  ;;  %714 = vmatpush.msrb.mxu1 %v1364_v7 }
 0x2f9   :  { %764 = vmatpush.msrb.mxu3 %v1364_v7  ;;  %745 = vmatpush.msrb.mxu2 %v1364_v7 }
 0x2fa   :  { %692 = vmatpush.msrb.mxu0 %v1364_v7  ;;  %715 = vmatpush.msrb.mxu1 %v1364_v7 }
 0x2fb   :  { %765 = vmatpush.msrb.mxu3 %v1364_v7  ;;  %746 = vmatpush.msrb.mxu2 %v1364_v7 }
 0x2fc   :  { %693 = vmatpush.msrb.mxu0 %v1364_v7  ;;  %716 = vmatpush.msrb.mxu1 %v1364_v7 }
 0x2fd   :  { %766 = vmatpush.msrb.mxu3 %v1364_v7  ;;  %747 = vmatpush.msrb.mxu2 %v1364_v7 }
 0x2fe   :  { %694 = vmatpush.msrb.mxu0 %v1364_v7  ;;  %717 = vmatpush.msrb.mxu1 %v1364_v7 }
 0x2ff   :  { %767 = vmatpush.msrb.mxu3 %v1364_v7  ;;  %748 = vmatpush.msrb.mxu2 %v1364_v7 }
 0x300   :  { %695 = vmatpush.msrb.mxu0 %v1364_v7  ;;  %718 = vmatpush.msrb.mxu1 %v1364_v7 }
 0x301   :  { %768 = vmatpush.msrb.mxu3 %v1364_v7  ;;  %749 = vmatpush.msrb.mxu2 %v1364_v7 }
 0x302   :  { %696 = vmatpush.msrb.mxu0 %v1364_v7  ;;  %719 = vmatpush.msrb.mxu1 %v1364_v7 }
 0x303   :  { %769 = vmatpush.msrb.mxu3 %v1364_v7 }
 0x304   :  { %697 = vmatpush.msrb.mxu0 %v1364_v7  ;;  %720 = vmatpush.msrb.mxu1 %v1364_v7 }
 0x305   :  { %770 = vmatpush.msrb.mxu3 %v1364_v7 }
 0x306   :  { %698 = vmatpush.msrb.mxu0 %v1364_v7  ;;  %721 = vmatpush.msrb.mxu1 %v1364_v7 }
 0x307   :  { %771 = vmatpush.msrb.mxu3 %v1364_v7 }
 0x308   :  { %699 = vmatpush.msrb.mxu0 %v1364_v7  ;;  %722 = vmatpush.msrb.mxu1 %v1364_v7 }
 0x309   :  { %772 = vmatpush.msrb.mxu3 %v1364_v7 }
 0x30a   :  { %700 = vmatpush.msrb.mxu0 %v1364_v7  ;;  %723 = vmatpush.msrb.mxu1 %v1364_v7 }
 0x30c   :  { %701 = vmatpush.msrb.mxu0 %v1364_v7  ;;  %724 = vmatpush.msrb.mxu1 %v1364_v7 }
 0x30e   :  { %702 = vmatpush.msrb.mxu0 %v1364_v7  ;;  %725 = vmatpush.msrb.mxu1 %v1364_v7 }
 0x310   :  { %703 = vmatpush.msrb.mxu0 %v1364_v7  ;;  %726 = vmatpush.msrb.mxu1 %v1364_v7 }
 0x362   :  { %v660_v13 = vpop.f32.mrf.mxu2 }
 0x363   :  { %750 = vmatmul.f32.vlgmr.msrb.gmra.mxu2 %v660_v13  ;;  %v686_v26 = vmul.f32 %v660_v13, %v660_v13 }
 0x36a   :  { %v680_v51 = vpop.f32.mrf.mxu3 }
 0x36b   :  { %773 = vmatmul.f32.vlgmr.msrb.gmra.mxu3 %v680_v51  ;;  %753 = vmatmul.f32.gmra.mxu2 %v686_v26  ;;  %v687_v4 = vmul.f32 %v680_v51, %v680_v51  ;;  %v824_v26 = vld [vmem:[%s2070_s3] sm:$0xff] }
 0x36e   :  { %v620_v52 = vpop.f32.mrf.mxu0  ;;  %v640_v12 = vpop.f32.mrf.mxu1 }
 0x36f   :  { %704 = vmatmul.f32.vlgmr.msrb.gmra.mxu0 %v620_v52  ;;  %727 = vmatmul.f32.vlgmr.msrb.gmra.mxu1 %v640_v12  ;;  %v684_v6 = vmul.f32 %v620_v52, %v620_v52  ;;  %v685_v8 = vmul.f32 %v640_v12, %v640_v12 }
 0x373   :  { %776 = vmatmul.f32.gmra.mxu3 %v687_v4 }
 0x377   :  { %707 = vmatmul.f32.gmra.mxu0 %v684_v6  ;;  %730 = vmatmul.f32.gmra.mxu1 %v685_v8 }
 0x3e6   :  { %v751_v29 = vpop.f32.mrf.mxu2 }
 0x3ec   :  { %v705_v10 = vpop.f32.mrf.mxu0  ;;  %v728_v11 = vpop.f32.mrf.mxu1 }
 0x3ed   :  { %v729_v54 = vadd.f32 %v728_v11, %v705_v10 }
 0x3ee   :  { %v774_v15 = vpop.f32.mrf.mxu3  ;;  %v754_v47 = vpop.f32.mrf.mxu2 }
 0x3ef   :  { %v752_v16 = vadd.f32 %v751_v29, %v729_v54 }
 0x3f1   :  { %v775_v30 = vadd.f32 %v774_v15, %v752_v16 }
 0x3f3   :  { %v780_v14 = vmul.f32 0.001953125, %v775_v30 }
 0x3f4   :  { %v708_v31 = vpop.f32.mrf.mxu0  ;;  %v731_v32 = vpop.f32.mrf.mxu1 }
 0x3f5   :  { %v732_v36 = vadd.f32 %v731_v32, %v708_v31  ;;  %v782_v61 = vmul.f32 %v780_v14, %v780_v14 }
 0x3f6   :  { %v777_v35 = vpop.f32.mrf.mxu3 }
 0x3f7   :  { %v755_v34 = vadd.f32 %v754_v47, %v732_v36  ;;  %v937_v36 = vmul.f32 %v1521_v18, %v1521_v18  ;;  %v938_v47 = vmul.f32 %v1523_v19, %v1523_v19 }
 0x3f9   :  { %v778_v38 = vadd.f32 %v777_v35, %v755_v34  ;;  %v940_v34 = vmul.f32 %v1527_v21, %v1527_v21  ;;  %v941_v35 = vmul.f32 %v1529_v22, %v1529_v22 }
 0x3fb   :  { %v781_v27 = vmul.f32 0.001953125, %v778_v38  ;;  %v942_v38 = vmul.f32 %v1531_v23, %v1531_v23 }
 0x3fd   :  { %v783_v17 = vsub.f32 %v781_v27, %v782_v61  ;;  %v943_v61 = vmul.f32 %v1533_v24, %v1533_v24  ;;  %v944_v27 = vmul.f32 %v1535_v25, %v1535_v25 }
 0x3ff   :  { %v784_v39 = vadd.f32 1e-05, %v783_v17 }
 0x401   :  { %1354 = vrsqrt.f32 %v784_v39  ;;  %vm791_vm15 = vweird.f32 %v784_v39 }
 0x407   :  { %v1355_v42 = vpop.eup %1354 }
 0x408   :  { %v786_v43 = vmul.f32 %v1355_v42, %v784_v39  ;;  %vm792_vm14 = vweird.f32 %v1355_v42 }
 0x409   :  { %vm793_vm0 = vmor %vm791_vm15, %vm792_vm14 }
 0x40a   :  { %v787_v5 = vmul.f32 %v1355_v42, %v786_v43 }
 0x40c   :  { %v788_v9 = vmul.f32 0.5, %v787_v5 }
 0x40e   :  { %v789_v1 = vsub.f32 1.5, %v788_v9 }
 0x410   :  { %v790_v46 = vmul.f32 %v1355_v42, %v789_v1 }
 0x412   :  { %v794_v48 = vsel %vm793_vm0, %v1355_v42, %v790_v46 }
 0x413   :  { %v795_v41 = vmul.f32 %v794_v48, %v683_v45 }
 0x415   :  { %804 = vperm.xlu1 %1345, %v795_v41   ;;  %v796_v49 = vmul.f32 %v795_v41, %v780_v14  ;;  %v939_v14 = vmul.f32 %v1525_v20, %v1525_v20 }
 0x417   :  { %798 = vrot.lane.b32.xlu0 %v796_v49, %s1366_s7 }
 0x487   :  { %v805_v55 = vpop.permute.xlu1 %804 }
 0x488   :  { %v807_v57 = vmul.f32 %v805_v55, %v620_v52  ;;  %v808_v58 = vmul.f32 %v805_v55, %v640_v12  ;;  %v809_v59 = vmul.f32 %v805_v55, %v660_v13  ;;  %v810_v33 = vmul.f32 %v805_v55, %v680_v51  ;;  %v825_v13 = vld [vmem:[%s2070_s3 + $0x8] sm:$0xff] }
 0x489   :  { %v799_v50 = vpop.permute.xlu0 %798 }
 0x48a   :  { %v801_v53 = vsub.f32 %v683_v45, %v799_v50 }
 0x48c   :  { %813 = vperm.xlu2 %1346, %v801_v53  }
 0x494   :  { %1347 = vset.pattern.permute.xlu2 %v1365_v40 }
 0x4e6   :  { %v814_v60 = vpop.permute.xlu2 %813 }
 0x4e7   :  { %v816_v62 = vadd.f32 %v814_v60, %v807_v57  ;;  %v817_v63 = vadd.f32 %v814_v60, %v808_v58  ;;  %v818_v2 = vadd.f32 %v814_v60, %v809_v59  ;;  %v819_v44 = vadd.f32 %v814_v60, %v810_v33 }
 0x4e9   :  { %v820_v0 = vmax.f32 %v816_v62, 0.0  ;;  %v821_v28 = vmax.f32 %v817_v63, 0.0  ;;  %v822_v3 = vmax.f32 %v818_v2, 0.0  ;;  %v823_v37 = vmax.f32 %v819_v44, 0.0 }
 0x4eb   :  { %848 = vmatpush.msra.mxu0 %v820_v0  ;;  %871 = vmatpush.msra.mxu1 %v821_v28 }
 0x4ec   :  { %894 = vmatpush.msra.mxu2 %v822_v3  ;;  %917 = vmatpush.msra.mxu3 %v823_v37 }
 0x4ed   :  { %1324 = vmatmul.msk.f32.vlgmr.msra.gmra.mxu0 %vm826_vm1, %v824_v26  ;;  %1326 = vmatmul.msk.f32.vlgmr.msra.gmra.mxu1 %vm826_vm1, %v824_v26 }
 0x4ee   :  { %1328 = vmatmul.msk.f32.vlgmr.msra.gmra.mxu2 %vm826_vm1, %v824_v26  ;;  %1330 = vmatmul.msk.f32.vlgmr.msra.gmra.mxu3 %vm826_vm1, %v824_v26 }
 0x4ef   :  { %945 = vmatpush.msrb.mxu0 %v1364_v7  ;;  %986 = vmatpush.msrb.mxu1 %v1364_v7 }
 0x4f0   :  { %1027 = vmatpush.msrb.mxu2 %v1364_v7  ;;  %1068 = vmatpush.msrb.mxu3 %v1364_v7 }
 0x4f1   :  { %946 = vmatpush.msrb.mxu0 %v1364_v7  ;;  %987 = vmatpush.msrb.mxu1 %v1364_v7 }
 0x4f2   :  { %1028 = vmatpush.msrb.mxu2 %v1364_v7  ;;  %1069 = vmatpush.msrb.mxu3 %v1364_v7 }
 0x4f3   :  { %947 = vmatpush.msrb.mxu0 %v1364_v7  ;;  %988 = vmatpush.msrb.mxu1 %v1364_v7 }
 0x4f4   :  { %1029 = vmatpush.msrb.mxu2 %v1364_v7  ;;  %1070 = vmatpush.msrb.mxu3 %v1364_v7 }
 0x4f5   :  { %1325 = vmatmul.msk.f32.gmra.mxu0 %vm826_vm1, %v825_v13  ;;  %1327 = vmatmul.msk.f32.gmra.mxu1 %vm826_vm1, %v825_v13 }
 0x4f6   :  { %1329 = vmatmul.msk.f32.gmra.mxu2 %vm826_vm1, %v825_v13  ;;  %1331 = vmatmul.msk.f32.gmra.mxu3 %vm826_vm1, %v825_v13 }
 0x4f7   :  { %948 = vmatpush.msrb.mxu0 %v1364_v7  ;;  %989 = vmatpush.msrb.mxu1 %v1364_v7 }
 0x4f8   :  { %1030 = vmatpush.msrb.mxu2 %v1364_v7  ;;  %1071 = vmatpush.msrb.mxu3 %v1364_v7 }
 0x4f9   :  { %949 = vmatpush.msrb.mxu0 %v1364_v7  ;;  %990 = vmatpush.msrb.mxu1 %v1364_v7 }
 0x4fa   :  { %1031 = vmatpush.msrb.mxu2 %v1364_v7  ;;  %1072 = vmatpush.msrb.mxu3 %v1364_v7 }
 0x4fb   :  { %950 = vmatpush.msrb.mxu0 %v1364_v7  ;;  %991 = vmatpush.msrb.mxu1 %v1364_v7 }
 0x4fc   :  { %1032 = vmatpush.msrb.mxu2 %v1364_v7  ;;  %1073 = vmatpush.msrb.mxu3 %v1364_v7 }
 0x4fd   :  { %951 = vmatpush.msrb.mxu0 %v1364_v7  ;;  %992 = vmatpush.msrb.mxu1 %v1364_v7 }
 0x4fe   :  { %1033 = vmatpush.msrb.mxu2 %v1364_v7  ;;  %1074 = vmatpush.msrb.mxu3 %v1364_v7 }
 0x4ff   :  { %952 = vmatpush.msrb.mxu0 %v1364_v7  ;;  %993 = vmatpush.msrb.mxu1 %v1364_v7 }
 0x500   :  { %1034 = vmatpush.msrb.mxu2 %v1364_v7  ;;  %1075 = vmatpush.msrb.mxu3 %v1364_v7 }
 0x501   :  { %953 = vmatpush.msrb.mxu0 %v1364_v7  ;;  %994 = vmatpush.msrb.mxu1 %v1364_v7 }
 0x502   :  { %1035 = vmatpush.msrb.mxu2 %v1364_v7  ;;  %1076 = vmatpush.msrb.mxu3 %v1364_v7 }
 0x503   :  { %954 = vmatpush.msrb.mxu0 %v1364_v7  ;;  %995 = vmatpush.msrb.mxu1 %v1364_v7 }
 0x504   :  { %1036 = vmatpush.msrb.mxu2 %v1364_v7  ;;  %1077 = vmatpush.msrb.mxu3 %v1364_v7 }
 0x505   :  { %955 = vmatpush.msrb.mxu0 %v1364_v7  ;;  %996 = vmatpush.msrb.mxu1 %v1364_v7 }
 0x506   :  { %1037 = vmatpush.msrb.mxu2 %v1364_v7  ;;  %1078 = vmatpush.msrb.mxu3 %v1364_v7 }
 0x507   :  { %956 = vmatpush.msrb.mxu0 %v1364_v7  ;;  %997 = vmatpush.msrb.mxu1 %v1364_v7 }
 0x508   :  { %1038 = vmatpush.msrb.mxu2 %v1364_v7  ;;  %1079 = vmatpush.msrb.mxu3 %v1364_v7 }
 0x509   :  { %957 = vmatpush.msrb.mxu0 %v1364_v7  ;;  %998 = vmatpush.msrb.mxu1 %v1364_v7 }
 0x50a   :  { %1039 = vmatpush.msrb.mxu2 %v1364_v7  ;;  %1080 = vmatpush.msrb.mxu3 %v1364_v7 }
 0x50b   :  { %958 = vmatpush.msrb.mxu0 %v1364_v7  ;;  %999 = vmatpush.msrb.mxu1 %v1364_v7 }
 0x50c   :  { %1040 = vmatpush.msrb.mxu2 %v1364_v7  ;;  %1081 = vmatpush.msrb.mxu3 %v1364_v7 }
 0x50d   :  { %959 = vmatpush.msrb.mxu0 %v1364_v7  ;;  %1000 = vmatpush.msrb.mxu1 %v1364_v7 }
 0x50e   :  { %1041 = vmatpush.msrb.mxu2 %v1364_v7  ;;  %1082 = vmatpush.msrb.mxu3 %v1364_v7 }
 0x50f   :  { %960 = vmatpush.msrb.mxu0 %v1364_v7  ;;  %1001 = vmatpush.msrb.mxu1 %v1364_v7 }
 0x510   :  { %1042 = vmatpush.msrb.mxu2 %v1364_v7  ;;  %1083 = vmatpush.msrb.mxu3 %v1364_v7 }
 0x56a   :  { %v1934_v51 = vpop.f32.mrf.mxu0  ;;  %v1936_v52 = vpop.f32.mrf.mxu1 }
 0x56b   :  { %961 = vmatmul.f32.vlgmr.msrb.gmra.mxu0 %v1934_v51  ;;  %1002 = vmatmul.f32.vlgmr.msrb.gmra.mxu1 %v1936_v52  ;;  %v929_v10 = vmul.f32 %v1934_v51, %v1934_v51  ;;  %v930_v11 = vmul.f32 %v1936_v52, %v1936_v52 }
 0x571   :  { %v1940_v12 = vpop.f32.mrf.mxu2  ;;  %v1942_v4 = vpop.f32.mrf.mxu3 }
 0x572   :  { %1043 = vmatmul.f32.vlgmr.msrb.gmra.mxu2 %v1940_v12  ;;  %1084 = vmatmul.f32.vlgmr.msrb.gmra.mxu3 %v1942_v4  ;;  %v1946_v6 = vpop.f32.mrf.mxu0  ;;  %v1948_v8 = vpop.f32.mrf.mxu1  ;;  %v931_v54 = vmul.f32 %v1940_v12, %v1940_v12  ;;  %v932_v15 = vmul.f32 %v1942_v4, %v1942_v4 }
 0x573   :  { %964 = vmatmul.f32.gmra.mxu0 %v1946_v6  ;;  %1005 = vmatmul.f32.gmra.mxu1 %v1948_v8  ;;  %v933_v16 = vmul.f32 %v1946_v6, %v1946_v6  ;;  %v934_v30 = vmul.f32 %v1948_v8, %v1948_v8 }
 0x579   :  { %v1952_v7 = vpop.f32.mrf.mxu2  ;;  %v1954_v29 = vpop.f32.mrf.mxu3 }
 0x57a   :  { %1046 = vmatmul.f32.gmra.mxu2 %v1952_v7  ;;  %1087 = vmatmul.f32.gmra.mxu3 %v1954_v29  ;;  %v935_v31 = vmul.f32 %v1952_v7, %v1952_v7  ;;  %v936_v32 = vmul.f32 %v1954_v29, %v1954_v29 }
 0x57b   :  { %967 = vmatmul.f32.gmra.mxu0 %v929_v10  ;;  %1008 = vmatmul.f32.gmra.mxu1 %v930_v11 }
 0x582   :  { %1049 = vmatmul.f32.gmra.mxu2 %v931_v54  ;;  %1090 = vmatmul.f32.gmra.mxu3 %v932_v15 }
 0x583   :  { %970 = vmatmul.f32.gmra.mxu0 %v933_v16  ;;  %1011 = vmatmul.f32.gmra.mxu1 %v934_v30 }
 0x58a   :  { %1052 = vmatmul.f32.gmra.mxu2 %v935_v31  ;;  %1093 = vmatmul.f32.gmra.mxu3 %v936_v32 }
 0x58b   :  { %973 = vmatmul.f32.gmra.mxu0 %v1521_v18  ;;  %1014 = vmatmul.f32.gmra.mxu1 %v1523_v19 }
 0x592   :  { %1055 = vmatmul.f32.gmra.mxu2 %v1525_v20  ;;  %1096 = vmatmul.f32.gmra.mxu3 %v1527_v21 }
 0x593   :  { %976 = vmatmul.f32.gmra.mxu0 %v1529_v22  ;;  %1017 = vmatmul.f32.gmra.mxu1 %v1531_v23 }
 0x59a   :  { %1058 = vmatmul.f32.gmra.mxu2 %v1533_v24  ;;  %1099 = vmatmul.f32.gmra.mxu3 %v1535_v25 }
 0x59b   :  { %979 = vmatmul.f32.gmra.mxu0 %v937_v36  ;;  %1020 = vmatmul.f32.gmra.mxu1 %v938_v47 }
 0x5a2   :  { %1061 = vmatmul.f32.gmra.mxu2 %v939_v14  ;;  %1102 = vmatmul.f32.gmra.mxu3 %v940_v34 }
 0x5a3   :  { %982 = vmatmul.f32.gmra.mxu0 %v941_v35  ;;  %1023 = vmatmul.f32.gmra.mxu1 %v942_v38 }
 0x5aa   :  { %1064 = vmatmul.f32.gmra.mxu2 %v943_v61  ;;  %1105 = vmatmul.f32.gmra.mxu3 %v944_v27 }
 0x5e8   :  { %v962_v17 = vpop.f32.mrf.mxu0  ;;  %v1003_v39 = vpop.f32.mrf.mxu1 }
 0x5e9   :  { %v1004_v46 = vadd.f32 %v1003_v39, %v962_v17 }
 0x5f0   :  { %v965_v42 = vpop.f32.mrf.mxu0  ;;  %v1006_v43 = vpop.f32.mrf.mxu1 }
 0x5f1   :  { %v1007_v55 = vadd.f32 %v1006_v43, %v965_v42 }
 0x5f5   :  { %v1044_v5 = vpop.f32.mrf.mxu2  ;;  %v1085_v9 = vpop.f32.mrf.mxu3 }
 0x5f6   :  { %v1045_v49 = vadd.f32 %v1044_v5, %v1004_v46 }
 0x5f8   :  { %v968_v1 = vpop.f32.mrf.mxu0  ;;  %v1009_v45 = vpop.f32.mrf.mxu1  ;;  %v1086_v57 = vadd.f32 %v1085_v9, %v1045_v49  ;;  %v2001_v49 = vld [vmem:[%s2067_s4 + $0x10] sm:$0xff] }
 0x5f9   :  { %v1010_v58 = vadd.f32 %v1009_v45, %v968_v1 }
 0x5fa   :  { %v1109_v60 = vmul.f32 0.001953125, %v1086_v57 }
 0x5fc   :  { %v1113_v44 = vmul.f32 %v1109_v60, %v1109_v60 }
 0x5fd   :  { %v1047_v48 = vpop.f32.mrf.mxu2  ;;  %v1088_v41 = vpop.f32.mrf.mxu3 }
 0x5fe   :  { %v1048_v62 = vadd.f32 %v1047_v48, %v1007_v55 }
 0x600   :  { %v971_v50 = vpop.f32.mrf.mxu0  ;;  %v1012_v53 = vpop.f32.mrf.mxu1  ;;  %v1089_v0 = vadd.f32 %v1088_v41, %v1048_v62 }
 0x601   :  { %v1013_v26 = vadd.f32 %v1012_v53, %v971_v50 }
 0x602   :  { %v1110_v54 = vmul.f32 0.001953125, %v1089_v0 }
 0x604   :  { %v1114_v31 = vmul.f32 %v1110_v54, %v1110_v54 }
 0x605   :  { %v1050_v59 = vpop.f32.mrf.mxu2  ;;  %v1091_v33 = vpop.f32.mrf.mxu3 }
 0x606   :  { %v1051_v63 = vadd.f32 %v1050_v59, %v1010_v58 }
 0x608   :  { %v1092_v2 = vadd.f32 %v1091_v33, %v1051_v63  ;;  %v974_v3 = vpop.f32.mrf.mxu0  ;;  %v1015_v37 = vpop.f32.mrf.mxu1 }
 0x609   :  { %v1016_v42 = vadd.f32 %v1015_v37, %v974_v3 }
 0x60a   :  { %v1111_v28 = vmul.f32 0.001953125, %v1092_v2 }
 0x60c   :  { %v1115_v13 = vsub.f32 %v1111_v28, %v1113_v44 }
 0x60d   :  { %v1053_v10 = vpop.f32.mrf.mxu2  ;;  %v1094_v11 = vpop.f32.mrf.mxu3 }
 0x60e   :  { %v1117_v15 = vadd.f32 1e-05, %v1115_v13  ;;  %v1054_v16 = vadd.f32 %v1053_v10, %v1013_v26  ;;  %v2008_v26 = vld [vmem:[%s2067_s4 + $0x18] sm:$0xff] }
 0x610   :  { %1356 = vrsqrt.f32 %v1117_v15  ;;  %v1095_v30 = vadd.f32 %v1094_v11, %v1054_v16  ;;  %v977_v47 = vpop.f32.mrf.mxu0  ;;  %v1018_v14 = vpop.f32.mrf.mxu1  ;;  %vm1125_vm3 = vweird.f32 %v1117_v15 }
 0x611   :  { %v1019_v33 = vadd.f32 %v1018_v14, %v977_v47 }
 0x612   :  { %v1112_v32 = vmul.f32 0.001953125, %v1095_v30 }
 0x614   :  { %v1116_v36 = vsub.f32 %v1112_v32, %v1114_v31 }
 0x615   :  { %v1056_v34 = vpop.f32.mrf.mxu2  ;;  %v1097_v35 = vpop.f32.mrf.mxu3 }
 0x616   :  { %v1357_v38 = vpop.eup %1356  ;;  %v1118_v61 = vadd.f32 1e-05, %v1116_v36  ;;  %v1057_v45 = vadd.f32 %v1056_v34, %v1016_v42 }
 0x617   :  { %v1120_v27 = vmul.f32 %v1357_v38, %v1117_v15  ;;  %vm1126_vm2 = vweird.f32 %v1357_v38 }
 0x618   :  { %1358 = vrsqrt.f32 %v1118_v61  ;;  %v980_v48 = vpop.f32.mrf.mxu0  ;;  %v1021_v41 = vpop.f32.mrf.mxu1  ;;  %vm1127_vm4 = vmor %vm1125_vm3, %vm1126_vm2  ;;  %v1098_v57 = vadd.f32 %v1097_v35, %v1057_v45  ;;  %vm1135_vm6 = vweird.f32 %v1118_v61 }
 0x619   :  { %v1121_v17 = vmul.f32 %v1357_v38, %v1120_v27  ;;  %v1022_v62 = vadd.f32 %v1021_v41, %v980_v48 }
 0x61a   :  { %v1153_v28 = vmul.f32 0.001953125, %v1098_v57 }
 0x61b   :  { %v1122_v39 = vmul.f32 0.5, %v1121_v17 }
 0x61c   :  { %v1157_v16 = vmul.f32 %v1153_v28, %v1153_v28 }
 0x61d   :  { %v1123_v43 = vsub.f32 1.5, %v1122_v39  ;;  %v1059_v5 = vpop.f32.mrf.mxu2  ;;  %v1100_v9 = vpop.f32.mrf.mxu3 }
 0x61e   :  { %v1359_v1 = vpop.eup %1358  ;;  %v1060_v3 = vadd.f32 %v1059_v5, %v1019_v33 }
 0x61f   :  { %v1130_v46 = vmul.f32 %v1359_v1, %v1118_v61  ;;  %v1124_v50 = vmul.f32 %v1357_v38, %v1123_v43  ;;  %vm1136_vm5 = vweird.f32 %v1359_v1 }
 0x620   :  { %vm1137_vm7 = vmor %vm1135_vm6, %vm1136_vm5  ;;  %v983_v11 = vpop.f32.mrf.mxu0  ;;  %v1101_v30 = vadd.f32 %v1100_v9, %v1060_v3 }
 0x621   :  { %v1131_v53 = vmul.f32 %v1359_v1, %v1130_v46  ;;  %v1128_v55 = vsel %vm1127_vm4, %v1357_v38, %v1124_v50  ;;  %v927_v50 = vld [vmem:[%s2067_s4 + $0x20] sm:$0xff] }
 0x622   :  { %v1139_v58 = vmul.f32 %v1128_v55, %v2001_v49  ;;  %v1154_v35 = vmul.f32 0.001953125, %v1101_v30 }
 0x623   :  { %v1132_v59 = vmul.f32 0.5, %v1131_v53 }
 0x624   :  { %v1141_v63 = vmul.f32 %v1139_v58, %v1109_v60  ;;  %v1024_v60 = vpop.f32.mrf.mxu1  ;;  %v1158_v39 = vmul.f32 %v1154_v35, %v1154_v35 }
 0x625   :  { %v1133_v2 = vsub.f32 1.5, %v1132_v59  ;;  %v1062_v44 = vpop.f32.mrf.mxu2  ;;  %v1103_v0 = vpop.f32.mrf.mxu3  ;;  %v1025_v36 = vadd.f32 %v1024_v60, %v983_v11 }
 0x626   :  { %v1063_v37 = vadd.f32 %v1062_v44, %v1022_v62  ;;  %1145 = vrot.lane.b32.xlu0 %v1141_v63, %s1366_s7  ;;  %v928_v63 = vld [vmem:[%s2067_s4 + $0x28] sm:$0xff] }
 0x627   :  { %v1134_v13 = vmul.f32 %v1359_v1, %v1133_v2 }
 0x628   :  { %v1104_v10 = vadd.f32 %v1103_v0, %v1063_v37 }
 0x629   :  { %v1138_v15 = vsel %vm1137_vm7, %v1359_v1, %v1134_v13 }
 0x62a   :  { %v1155_v31 = vmul.f32 0.001953125, %v1104_v10  ;;  %v1140_v32 = vmul.f32 %v1138_v15, %v2008_v26 }
 0x62c   :  { %v1159_v47 = vsub.f32 %v1155_v31, %v1157_v16  ;;  %v1142_v14 = vmul.f32 %v1140_v32, %v1110_v54 }
 0x62d   :  { %v1065_v34 = vpop.f32.mrf.mxu2  ;;  %v1106_v27 = vpop.f32.mrf.mxu3 }
 0x62e   :  { %v1161_v38 = vadd.f32 1e-05, %v1159_v47  ;;  %v1066_v61 = vadd.f32 %v1065_v34, %v1025_v36  ;;  %1147 = vrot.lane.b32.xlu1 %v1142_v14, %s1366_s7 }
 0x630   :  { %1360 = vrsqrt.f32 %v1161_v38  ;;  %v1107_v17 = vadd.f32 %v1106_v27, %v1066_v61  ;;  %vm1169_vm9 = vweird.f32 %v1161_v38 }
 0x632   :  { %v1156_v42 = vmul.f32 0.001953125, %v1107_v17 }
 0x634   :  { %v1160_v43 = vsub.f32 %v1156_v42, %v1158_v39 }
 0x636   :  { %v1361_v5 = vpop.eup %1360  ;;  %v1162_v9 = vadd.f32 1e-05, %v1160_v43  ;;  %1199 = vperm.xlu1 %1345, %v1139_v58  }
 0x637   :  { %v1164_v1 = vmul.f32 %v1361_v5, %v1161_v38  ;;  %vm1170_vm8 = vweird.f32 %v1361_v5 }
 0x638   :  { %1362 = vrsqrt.f32 %v1162_v9  ;;  %vm1171_vm10 = vmor %vm1169_vm9, %vm1170_vm8  ;;  %vm1179_vm12 = vweird.f32 %v1162_v9 }
 0x639   :  { %v1165_v45 = vmul.f32 %v1361_v5, %v1164_v1 }
 0x63b   :  { %v1166_v46 = vmul.f32 0.5, %v1165_v45 }
 0x63d   :  { %v1167_v54 = vsub.f32 1.5, %v1166_v46 }
 0x63e   :  { %v1363_v48 = vpop.eup %1362  ;;  %1349 = vset.pattern.permute.xlu1 %v1367_v56 }
 0x63f   :  { %v1174_v41 = vmul.f32 %v1363_v48, %v1162_v9  ;;  %v1168_v53 = vmul.f32 %v1361_v5, %v1167_v54  ;;  %vm1180_vm11 = vweird.f32 %v1363_v48 }
 0x640   :  { %vm1181_vm13 = vmor %vm1179_vm12, %vm1180_vm11 }
 0x641   :  { %v1175_v55 = vmul.f32 %v1363_v48, %v1174_v41  ;;  %v1172_v57 = vsel %vm1171_vm10, %v1361_v5, %v1168_v53 }
 0x642   :  { %v1183_v58 = vmul.f32 %v1172_v57, %v927_v50 }
 0x643   :  { %v1176_v59 = vmul.f32 0.5, %v1175_v55 }
 0x644   :  { %v1185_v33 = vmul.f32 %v1183_v58, %v1153_v28 }
 0x645   :  { %v1177_v62 = vsub.f32 1.5, %v1176_v59 }
 0x646   :  { %1189 = vrot.lane.b32.xlu2 %v1185_v33, %s1366_s7 }
 0x647   :  { %v1178_v2 = vmul.f32 %v1363_v48, %v1177_v62 }
 0x649   :  { %v1182_v44 = vsel %vm1181_vm13, %v1363_v48, %v1178_v2 }
 0x64a   :  { %v1184_v0 = vmul.f32 %v1182_v44, %v928_v63 }
 0x64c   :  { %v1186_v3 = vmul.f32 %v1184_v0, %v1154_v35 }
 0x64e   :  { %1204 = vperm.xlu2 %1347, %v1140_v32   ;;  %1191 = vrot.lane.b32.xlu0 %v1186_v3, %s1366_s7 }
 0x656   :  { %1235 = vperm.xlu2 %1347, %v1183_v58  }
 0x65e   :  { %1351 = vset.pattern.permute.xlu2 %v1367_v56 }
 0x698   :  { %v1146_v28 = vpop.permute.xlu0 %1145 }
 0x699   :  { %v1151_v37 = vsub.f32 %v2001_v49, %v1146_v28 }
 0x69b   :  { %1217 = vperm.xlu0 %1348, %v1151_v37  }
 0x6a0   :  { %v1148_v13 = vpop.permute.xlu1 %1147  ;;  %v1190_v10 = vpop.permute.xlu2 %1189 }
 0x6a1   :  { %v1152_v11 = vsub.f32 %v2008_v26, %v1148_v13  ;;  %v1195_v60 = vsub.f32 %v927_v50, %v1190_v10 }
 0x6a3   :  { %1222 = vperm.xlu1 %1349, %v1152_v11   ;;  %1261 = vperm.xlu2 %1351, %v1195_v60  }
 0x6a8   :  { %v1205_v30 = vpop.permute.xlu2 %1204  ;;  %v1200_v31 = vpop.permute.xlu1 %1199 }
 0x6a9   :  { %v1207_v32 = vmul.f32 %v1200_v31, %v1934_v51  ;;  %v1208_v49 = vmul.f32 %v1200_v31, %v1936_v52  ;;  %v1209_v36 = vmul.f32 %v1200_v31, %v1940_v12  ;;  %v1210_v26 = vmul.f32 %v1200_v31, %v1942_v4 }
 0x6aa   :  { %v1211_v46 = vmul.f32 %v1205_v30, %v1946_v6  ;;  %v1212_v54 = vmul.f32 %v1205_v30, %v1948_v8  ;;  %v1213_v48 = vmul.f32 %v1205_v30, %v1952_v7  ;;  %v1214_v41 = vmul.f32 %v1205_v30, %v1954_v29 }
 0x6ab   :  { %1350 = vset.pattern.permute.xlu1 %v1365_v40 }
 0x6ac   :  { %1240 = vperm.xlu1 %1350, %v1184_v0  }
 0x6b0   :  { %v1236_v56 = vpop.permute.xlu2 %1235 }
 0x6b1   :  { %v1243_v47 = vmul.f32 %v1236_v56, %v1521_v18  ;;  %v1244_v14 = vmul.f32 %v1236_v56, %v1523_v19  ;;  %v1245_v40 = vmul.f32 %v1236_v56, %v1525_v20  ;;  %v1246_v34 = vmul.f32 %v1236_v56, %v1527_v21 }
 0x6c0   :  { %v1192_v15 = vpop.permute.xlu0 %1191 }
 0x6c1   :  { %v1196_v16 = vsub.f32 %v928_v63, %v1192_v15 }
 0x6c3   :  { %1266 = vperm.xlu0 %1348, %v1196_v16  }
 0x6fd   :  { %v1262_v12 = vpop.permute.xlu2 %1261 }
 0x70d   :  { %v1218_v35 = vpop.permute.xlu0 %1217 }
 0x70e   :  { %v1225_v38 = vadd.f32 %v1218_v35, %v1207_v32  ;;  %v1226_v61 = vadd.f32 %v1218_v35, %v1208_v49  ;;  %v1227_v27 = vadd.f32 %v1218_v35, %v1209_v36  ;;  %v1228_v17 = vadd.f32 %v1218_v35, %v1210_v26 }
 0x710   :  { %v1251_v51 = vadd.f32 %v1243_v47, %v1225_v38  ;;  %v1252_v39 = vadd.f32 %v1244_v14, %v1226_v61  ;;  %v1253_v52 = vadd.f32 %v1245_v40, %v1227_v27  ;;  %v1254_v42 = vadd.f32 %v1246_v34, %v1228_v17 }
 0x712   :  { %v1269_v43 = vadd.f32 %v1262_v12, %v1251_v51  ;;  %v1270_v4 = vadd.f32 %v1262_v12, %v1252_v39  ;;  %v1271_v5 = vadd.f32 %v1262_v12, %v1253_v52  ;;  %v1272_v18 = vadd.f32 %v1262_v12, %v1254_v42 }
 0x714   :  { %v1277_v9 = vmax.f32 %v1269_v43, 0.0  ;;  %v1278_v19 = vmax.f32 %v1270_v4, 0.0  ;;  %v1279_v1 = vmax.f32 %v1271_v5, 0.0  ;;  %v1280_v20 = vmax.f32 %v1272_v18, 0.0 }
 0x715   :  { %v1223_v21 = vpop.permute.xlu1 %1222 }
 0x716   :  { %1285 = vst [vmem:[%s2071_s6] sm:$0xff] %v1277_v9  ;;  %v1229_v58 = vadd.f32 %v1223_v21, %v1211_v46  ;;  %v1230_v59 = vadd.f32 %v1223_v21, %v1212_v54  ;;  %v1231_v33 = vadd.f32 %v1223_v21, %v1213_v48  ;;  %v1232_v62 = vadd.f32 %v1223_v21, %v1214_v41 }
 0x717   :  { %1286 = vst [vmem:[%s2071_s6 + $0x8] sm:$0xff] %v1278_v19 }
 0x718   :  { %1287 = vst [vmem:[%s2071_s6 + $0x10] sm:$0xff] %v1279_v1 }
 0x719   :  { %1288 = vst [vmem:[%s2071_s6 + $0x18] sm:$0xff] %v1280_v20 }
 0x71e   :  { %v1241_v45 = vpop.permute.xlu1 %1240 }
 0x71f   :  { %v1247_v50 = vmul.f32 %v1241_v45, %v1529_v22  ;;  %v1248_v53 = vmul.f32 %v1241_v45, %v1531_v23  ;;  %v1249_v55 = vmul.f32 %v1241_v45, %v1533_v24  ;;  %v1250_v57 = vmul.f32 %v1241_v45, %v1535_v25 }
 0x721   :  { %v1255_v63 = vadd.f32 %v1247_v50, %v1229_v58  ;;  %v1256_v6 = vadd.f32 %v1248_v53, %v1230_v59  ;;  %v1257_v2 = vadd.f32 %v1249_v55, %v1231_v33  ;;  %v1258_v8 = vadd.f32 %v1250_v57, %v1232_v62 }
 0x735   :  { %v1267_v44 = vpop.permute.xlu0 %1266 }
 0x736   :  { %v1273_v7 = vadd.f32 %v1267_v44, %v1255_v63  ;;  %v1274_v0 = vadd.f32 %v1267_v44, %v1256_v6  ;;  %v1275_v29 = vadd.f32 %v1267_v44, %v1257_v2  ;;  %v1276_v3 = vadd.f32 %v1267_v44, %v1258_v8 }
 0x738   :  { %v1281_v22 = vmax.f32 %v1273_v7, 0.0  ;;  %v1282_v28 = vmax.f32 %v1274_v0, 0.0  ;;  %v1283_v23 = vmax.f32 %v1275_v29, 0.0  ;;  %v1284_v37 = vmax.f32 %v1276_v3, 0.0 }
 0x73a   :  { %1289 = vst [vmem:[%s2071_s6 + $0x20] sm:$0xff] %v1281_v22 }
 0x73b   :  { %1290 = vst [vmem:[%s2071_s6 + $0x28] sm:$0xff] %v1282_v28 }
 0x73c   :  { %1291 = vst [vmem:[%s2071_s6 + $0x30] sm:$0xff] %v1283_v23 }
 0x73d   :  { %1292 = vst [vmem:[%s2071_s6 + $0x38] sm:$0xff] %v1284_v37 }

</bundles_post_ra>
